<compile_context>
chip_gen: v7x
topology: tpu7x:2x2x1
jax: 0.10.0
libtpu: 0.0.40
codegen_flags: <defaults>
</compile_context>

<pallas_src>
import functools

import jax
import jax.numpy as jnp
from jax.experimental import pallas as pl
from jax.experimental.pallas import tpu as pltpu


# ---------------------------------------------------------------------------
# Fused forward kernel: stacked LSTM + LayerNorm + Linear head (one batch tile).
# ---------------------------------------------------------------------------
def _fused_kernel(*refs, num_layers, hidden, seq_len, batch_tile):
    H, T, BT = hidden, seq_len, batch_tile

    x_ref = refs[0]                                           # (T, BT, I)
    layer_w = [refs[1 + 3 * l: 4 + 3 * l] for l in range(num_layers)]
    base = 1 + 3 * num_layers
    gamma_ref, beta_ref, w_fc_ref, b_fc_ref = refs[base: base + 4]
    out_ref = refs[base + 4]                                  # (BT, O)
    proj_sc = refs[base + 5]                                  # (T*BT, 4H) scratch
    hseq_sc = refs[base + 6]                                  # (T*BT, H)  scratch

    # -------- layer- and time-invariant gate constants (hoisted once) --------
    # PyTorch gate order along 4H is [i, f, g, o]; only g uses tanh.
    lane = jax.lax.broadcasted_iota(jnp.int32, (BT, 4 * H), 1)
    g_lane = (lane >= 2 * H) & (lane < 3 * H)
    gate_scale = jnp.where(g_lane, 1.0, 0.5)   # tanh-argument prescale
    gate_shift = jnp.where(g_lane, 0.0, 0.5)   # sigmoid(x) = 0.5*tanh(x/2)+0.5

    cur = x_ref[...].reshape(T * BT, x_ref.shape[-1])         # (T*BT, C_in) f32
    h_last = None
    for l in range(num_layers):
        w_ih_ref, w_hh_ref, b_ref = layer_w[l]
        is_last_layer = (l == num_layers - 1)

        # Input projection for all time steps at once (off the serial path).
        proj_sc[...] = (
            jnp.dot(cur.astype(jnp.bfloat16), w_ih_ref[...],
                    preferred_element_type=jnp.float32)
            + b_ref[...])                                      # (T*BT, 4H) f32

        # Load the recurrent weights once per layer; the repeated dot below
        # reuses the latched MXU RHS across the whole time loop.
        w_hh = w_hh_ref[...]                                   # (H, 4H) bf16

        def step(t, carry, w_hh=w_hh, is_last_layer=is_last_layer):
            h_prev, c_prev = carry
            row = pl.multiple_of(t * BT, BT)
            gates = proj_sc[pl.ds(row, BT), :] + jnp.dot(
                h_prev.astype(jnp.bfloat16), w_hh,
                preferred_element_type=jnp.float32)            # (BT, 4H) f32

            # Single full-vreg tanh, then a fused mul-add turns the i/f/o
            # lanes into sigmoids and leaves the g lanes as tanh.
            th = jnp.tanh(gates * gate_scale)
            act = th * gate_scale + gate_shift

            # TODO(synk): H=32 lane slices may emit XLU rotates; fine at this
            # size -- re-check the bundle dump before scaling H.
            i_g = act[:, 0 * H:1 * H]
            f_g = act[:, 1 * H:2 * H]
            g_g = act[:, 2 * H:3 * H]
            o_g = act[:, 3 * H:4 * H]

            c_new = f_g * c_prev + i_g * g_g
            h_new = o_g * jnp.tanh(c_new)

            if not is_last_layer:
                hseq_sc[pl.ds(row, BT), :] = h_new   # feeds the next layer
            return (h_new, c_new)

        h0 = jnp.zeros((BT, H), jnp.float32)
        c0 = jnp.zeros((BT, H), jnp.float32)
        h_last, _ = jax.lax.fori_loop(0, T, step, (h0, c0),
                                      unroll=min(T, 8))

        if not is_last_layer:
            cur = hseq_sc[...]                       # (T*BT, H)

    # LayerNorm (biased variance, eps=1e-5, torch defaults) on the last hidden
    # state (LN is per-row over H, so LN(seq)[:, -1] == LN(seq[:, -1])) + head.
    h = h_last                                       # (BT, H)
    mean = jnp.mean(h, axis=-1, keepdims=True)
    var = jnp.mean(jnp.square(h - mean), axis=-1, keepdims=True)
    normed = (h - mean) * jax.lax.rsqrt(var + 1e-5)
    normed = normed * gamma_ref[...] + beta_ref[...]
    out = jnp.dot(normed.astype(jnp.bfloat16), w_fc_ref[...],
                  preferred_element_type=jnp.float32) + b_fc_ref[...]
    out_ref[...] = out.astype(out_ref.dtype)


# ---------------------------------------------------------------------------
# Wrapper (matches LSTMForecasting.forward, unidirectional, eval mode).
# ---------------------------------------------------------------------------
def lstm_forecasting_forward(x, params):
    """x: (B, T, input_size) batch-first, like PyTorch. Returns (B, output_size)."""
    B, T, I = x.shape
    H = params["lstm"][0]["w_hh_t"].shape[0]
    O = params["w_fc_t"].shape[1]
    num_layers = len(params["lstm"])

    # Pad batch to the f32 sublane count so every vreg row is used.
    B_pad = max(8, ((B + 7) // 8) * 8)
    if B_pad != B:
        x = jnp.pad(x, ((0, B_pad - B), (0, 0), (0, 0)))
    x_tm = jnp.transpose(x, (1, 0, 2))               # (T, B_pad, I) time-major

    # Batch-tile grid: two tiles when the padded batch splits into full
    # sublane tiles (lets v7x's two TensorCores each take half the batch);
    # otherwise a single tile (v5e/v6e have one TC anyway).
    n_tiles = 2 if (B_pad >= 16 and B_pad % 16 == 0) else 1
    BT = B_pad // n_tiles

    bf16 = jnp.bfloat16
    inputs = [x_tm]
    in_specs = [pl.BlockSpec((T, BT, I), lambda b: (0, b, 0))]
    for layer in params["lstm"]:
        w_ih = layer["w_ih_t"].astype(bf16)          # (C_in, 4H) bf16
        w_hh = layer["w_hh_t"].astype(bf16)          # (H, 4H)    bf16
        b = layer["b"]                               # (1, 4H)    f32
        inputs += [w_ih, w_hh, b]
        in_specs += [pl.BlockSpec(w_ih.shape, lambda b_: (0, 0)),
                     pl.BlockSpec(w_hh.shape, lambda b_: (0, 0)),
                     pl.BlockSpec(b.shape, lambda b_: (0, 0))]
    w_fc = params["w_fc_t"].astype(bf16)             # (H, O) bf16
    for arr in (params["gamma"], params["beta"], w_fc, params["b_fc"]):
        inputs.append(arr)
        in_specs.append(pl.BlockSpec(arr.shape, lambda b_: (0, 0)))

    out = pl.pallas_call(
        functools.partial(_fused_kernel, num_layers=num_layers, hidden=H,
                          seq_len=T, batch_tile=BT),
        grid=(n_tiles,),
        out_shape=jax.ShapeDtypeStruct((B_pad, O), jnp.float32),
        in_specs=in_specs,
        out_specs=pl.BlockSpec((BT, O), lambda b: (b, 0)),
        scratch_shapes=[
            pltpu.VMEM((T * BT, 4 * H), jnp.float32),  # batched input projection
            pltpu.VMEM((T * BT, H), jnp.float32),      # inter-layer hidden seq
        ],
        compiler_params=pltpu.CompilerParams(
            dimension_semantics=("parallel",),          # batch tiles independent
            vmem_limit_bytes=32 * 1024 * 1024),         # v5e default is only 16 MiB
    )(*inputs)
    return out[:B]


# ---------------------------------------------------------------------------
# Deterministic parameter init (PyTorch-style uniform(-1/sqrt(H), 1/sqrt(H))).
# ---------------------------------------------------------------------------
def init_params(key, input_size, hidden_size, num_layers, output_size):
    # TODO(synk): dropout between layers is a training-time no-op here;
    # bidirectional=False (module default) only.
    k = 1.0 / jnp.sqrt(hidden_size)
    params = {"lstm": []}
    for layer in range(num_layers):
        in_feat = input_size if layer == 0 else hidden_size
        key, k1, k2, k3, k4 = jax.random.split(key, 5)
        w_ih = jax.random.uniform(k1, (4 * hidden_size, in_feat),
                                  jnp.float32, -k, k)
        w_hh = jax.random.uniform(k2, (4 * hidden_size, hidden_size),
                                  jnp.float32, -k, k)
        b_ih = jax.random.uniform(k3, (4 * hidden_size,), jnp.float32, -k, k)
        b_hh = jax.random.uniform(k4, (4 * hidden_size,), jnp.float32, -k, k)
        params["lstm"].append({
            "w_ih_t": w_ih.T,                                # (in_feat, 4H)
            "w_hh_t": w_hh.T,                                # (H, 4H)
            "b": (b_ih + b_hh).reshape(1, 4 * hidden_size),  # (1, 4H)
        })
    key, k5, k6 = jax.random.split(key, 3)
    kf = 1.0 / jnp.sqrt(hidden_size)
    w_fc = jax.random.uniform(k5, (output_size, hidden_size), jnp.float32, -kf, kf)
    b_fc = jax.random.uniform(k6, (output_size,), jnp.float32, -kf, kf)
    params["w_fc_t"] = w_fc.T                                # (H, O)
    params["b_fc"] = b_fc.reshape(1, output_size)
    params["gamma"] = jnp.ones((1, hidden_size), jnp.float32)
    params["beta"] = jnp.zeros((1, hidden_size), jnp.float32)
    return params


# ---------------------------------------------------------------------------
# Pure-JAX reference (lax.scan LSTM) for a correctness sanity check.
# ---------------------------------------------------------------------------
def reference_forward(x, params):
    x_tm = jnp.transpose(x, (1, 0, 2))
    h_seq = x_tm
    for layer in params["lstm"]:
        H = layer["w_hh_t"].shape[0]
        B = x.shape[0]

        def step(carry, x_t, layer=layer, H=H):
            h_prev, c_prev = carry
            gates = (x_t @ layer["w_ih_t"] + h_prev @ layer["w_hh_t"]
                     + layer["b"][0])
            i = jax.nn.sigmoid(gates[:, 0 * H:1 * H])
            f = jax.nn.sigmoid(gates[:, 1 * H:2 * H])
            g = jnp.tanh(gates[:, 2 * H:3 * H])
            o = jax.nn.sigmoid(gates[:, 3 * H:4 * H])
            c = f * c_prev + i * g
            h = o * jnp.tanh(c)
            return (h, c), h

        init = (jnp.zeros((B, H), jnp.float32), jnp.zeros((B, H), jnp.float32))
        _, h_seq = jax.lax.scan(step, init, h_seq)
    h_last = h_seq[-1]
    mean = jnp.mean(h_last, axis=-1, keepdims=True)
    var = jnp.mean((h_last - mean) ** 2, axis=-1, keepdims=True)
    normed = (h_last - mean) * jax.lax.rsqrt(var + 1e-5)
    normed = normed * params["gamma"] + params["beta"]
    return normed @ params["w_fc_t"] + params["b_fc"]


if __name__ == "__main__":
    batch, look_back = 4, 8
    input_size, hidden_size, num_layers, output_size = 16, 32, 2, 4

    key = jax.random.PRNGKey(0)
    key, xk, pk = jax.random.split(key, 3)
    x = jax.random.normal(xk, (batch, look_back, input_size), jnp.float32)
    params = init_params(pk, input_size, hidden_size, num_layers, output_size)

    out = jax.block_until_ready(lstm_forecasting_forward(x, params))
    assert out.shape == (batch, output_size), out.shape

    ref = jax.block_until_ready(reference_forward(x, params))
    max_diff = float(jnp.max(jnp.abs(out - ref)))
    assert jnp.allclose(out, ref, atol=2e-2, rtol=2e-2), max_diff

    print("KERNEL_OK")
</pallas_src>

<mosaic_0001>
module attributes {stable_mosaic.version = 11 : i64} {
  func.func @_fused_kernel(%arg0: i32, %arg1: memref<8x8x16xf32, #tpu.memory_space<vmem>>, %arg2: memref<16x128xbf16, #tpu.memory_space<vmem>>, %arg3: memref<32x128xbf16, #tpu.memory_space<vmem>>, %arg4: memref<1x128xf32, #tpu.memory_space<vmem>>, %arg5: memref<32x128xbf16, #tpu.memory_space<vmem>>, %arg6: memref<32x128xbf16, #tpu.memory_space<vmem>>, %arg7: memref<1x128xf32, #tpu.memory_space<vmem>>, %arg8: memref<1x32xf32, #tpu.memory_space<vmem>>, %arg9: memref<1x32xf32, #tpu.memory_space<vmem>>, %arg10: memref<32x4xbf16, #tpu.memory_space<vmem>>, %arg11: memref<1x4xf32, #tpu.memory_space<vmem>>, %arg12: memref<8x4xf32, #tpu.memory_space<vmem>>, %arg13: memref<64x128xf32, #tpu.memory_space<vmem>>, %arg14: memref<64x32xf32, #tpu.memory_space<vmem>>) attributes {dimension_semantics = [#tpu.dimension_semantics<parallel>], iteration_bounds = array<i64: 1>, scalar_prefetch = 0 : i64, scratch_operands = 2 : i64, tpu.core_type = #tpu.core_type<tc>, window_params = [{transform_indices = @transform_0, window_bounds = array<i64: 8, 8, 16>}, {pipeline_mode = #tpu.pipeline_mode<synchronous>, transform_indices = @transform_1, window_bounds = array<i64: 16, 128>}, {pipeline_mode = #tpu.pipeline_mode<synchronous>, transform_indices = @transform_2, window_bounds = array<i64: 32, 128>}, {pipeline_mode = #tpu.pipeline_mode<synchronous>, transform_indices = @transform_3, window_bounds = array<i64: 1, 128>}, {pipeline_mode = #tpu.pipeline_mode<synchronous>, transform_indices = @transform_4, window_bounds = array<i64: 32, 128>}, {pipeline_mode = #tpu.pipeline_mode<synchronous>, transform_indices = @transform_5, window_bounds = array<i64: 32, 128>}, {pipeline_mode = #tpu.pipeline_mode<synchronous>, transform_indices = @transform_6, window_bounds = array<i64: 1, 128>}, {pipeline_mode = #tpu.pipeline_mode<synchronous>, transform_indices = @transform_7, window_bounds = array<i64: 1, 32>}, {pipeline_mode = #tpu.pipeline_mode<synchronous>, transform_indices = @transform_8, window_bounds = array<i64: 1, 32>}, {pipeline_mode = #tpu.pipeline_mode<synchronous>, transform_indices = @transform_9, window_bounds = array<i64: 32, 4>}, {pipeline_mode = #tpu.pipeline_mode<synchronous>, transform_indices = @transform_10, window_bounds = array<i64: 1, 4>}, {transform_indices = @transform_11, window_bounds = array<i64: 8, 4>}]} {
    %0 = tpu.iota {dimensions = array<i32: 1>} : vector<8x128xi32>
    %c64_i32 = arith.constant 64 : i32
    %1 = vector.broadcast %c64_i32 : i32 to vector<8x128xi32>
    %2 = arith.cmpi sge, %0, %1 : vector<8x128xi32>
    %c96_i32 = arith.constant 96 : i32
    %3 = vector.broadcast %c96_i32 : i32 to vector<8x128xi32>
    %4 = arith.cmpi slt, %0, %3 : vector<8x128xi32>
    %5 = arith.andi %2, %4 : vector<8x128xi1>
    %cst = arith.constant 1.000000e+00 : f32
    %cst_0 = arith.constant 5.000000e-01 : f32
    %6 = vector.broadcast %cst : f32 to vector<8x128xf32>
    %7 = vector.broadcast %cst_0 : f32 to vector<8x128xf32>
    %8 = arith.select %5, %6, %7 : vector<8x128xi1>, vector<8x128xf32>
    %cst_1 = arith.constant 0.000000e+00 : f32
    %cst_2 = arith.constant 5.000000e-01 : f32
    %9 = vector.broadcast %cst_1 : f32 to vector<8x128xf32>
    %10 = vector.broadcast %cst_2 : f32 to vector<8x128xf32>
    %11 = arith.select %5, %9, %10 : vector<8x128xi1>, vector<8x128xf32>
    %c0 = arith.constant 0 : index
    %c0_3 = arith.constant 0 : index
    %c0_4 = arith.constant 0 : index
    %12 = vector.load %arg1[%c0, %c0_3, %c0_4] : memref<8x8x16xf32, #tpu.memory_space<vmem>>, vector<8x8x16xf32>
    %13 = vector.shape_cast %12 : vector<8x8x16xf32> to vector<64x16xf32>
    %14 = arith.truncf %13 : vector<64x16xf32> to vector<64x16xbf16>
    %c0_5 = arith.constant 0 : index
    %c0_6 = arith.constant 0 : index
    %15 = vector.load %arg2[%c0_5, %c0_6] : memref<16x128xbf16, #tpu.memory_space<vmem>>, vector<16x128xbf16>
    %cst_7 = arith.constant dense<0.000000e+00> : vector<64x128xf32>
    %16 = tpu.matmul %14, %15, %cst_7 {dimension_numbers = #tpu.dot_dimension_numbers<[1], [0], [0], [1], [0, 0, 1, 1], [], []>} : vector<64x16xbf16>, vector<16x128xbf16>, vector<64x128xf32> -> vector<64x128xf32>
    %c0_8 = arith.constant 0 : index
    %c0_9 = arith.constant 0 : index
    %17 = vector.load %arg4[%c0_8, %c0_9] : memref<1x128xf32, #tpu.memory_space<vmem>>, vector<1x128xf32>
    %18 = vector.broadcast %17 : vector<1x128xf32> to vector<64x128xf32>
    %19 = arith.addf %16, %18 : vector<64x128xf32>
    %c0_10 = arith.constant 0 : index
    %c0_11 = arith.constant 0 : index
    %20 = vector.load %arg13[%c0_10, %c0_11] : memref<64x128xf32, #tpu.memory_space<vmem>>, vector<64x128xf32>
    tpu.vector_store %arg13[%c0_10, %c0_11], %19 {strides = array<i32>} : memref<64x128xf32, #tpu.memory_space<vmem>>, vector<64x128xf32>,
    %c0_12 = arith.constant 0 : index
    %c0_13 = arith.constant 0 : index
    %21 = vector.load %arg3[%c0_12, %c0_13] : memref<32x128xbf16, #tpu.memory_space<vmem>>, vector<32x128xbf16>
    %cst_14 = arith.constant 0.000000e+00 : f32
    %22 = vector.broadcast %cst_14 : f32 to vector<8x32xf32>
    %cst_15 = arith.constant 0.000000e+00 : f32
    %23 = vector.broadcast %cst_15 : f32 to vector<8x32xf32>
    %c0_i32 = arith.constant 0 : i32
    %c8_i32 = arith.constant 8 : i32
    %24 = arith.muli %c0_i32, %c8_i32 : i32
    %25 = tpu.assume_multiple %24, 8 : i32
    %26 = arith.index_cast %25 : i32 to index
    %c0_16 = arith.constant 0 : index
    %27 = vector.load %arg13[%26, %c0_16] : memref<64x128xf32, #tpu.memory_space<vmem>>, vector<8x128xf32>
    %28 = arith.truncf %22 : vector<8x32xf32> to vector<8x32xbf16>
    %cst_17 = arith.constant dense<0.000000e+00> : vector<8x128xf32>
    %29 = tpu.matmul %28, %21, %cst_17 {dimension_numbers = #tpu.dot_dimension_numbers<[1], [0], [0], [1], [0, 0, 1, 1], [], []>} : vector<8x32xbf16>, vector<32x128xbf16>, vector<8x128xf32> -> vector<8x128xf32>
    %30 = arith.addf %27, %29 : vector<8x128xf32>
    %31 = arith.mulf %30, %8 : vector<8x128xf32>
    %32 = math.tanh %31 : vector<8x128xf32>
    %33 = arith.mulf %32, %8 : vector<8x128xf32>
    %34 = arith.addf %33, %11 : vector<8x128xf32>
    %35 = vector.extract_strided_slice %34 {offsets = [0, 0], sizes = [8, 32], strides = [1, 1]} : vector<8x128xf32> to vector<8x32xf32>
    %36 = vector.extract_strided_slice %34 {offsets = [0, 32], sizes = [8, 32], strides = [1, 1]} : vector<8x128xf32> to vector<8x32xf32>
    %37 = vector.extract_strided_slice %34 {offsets = [0, 64], sizes = [8, 32], strides = [1, 1]} : vector<8x128xf32> to vector<8x32xf32>
    %38 = vector.extract_strided_slice %34 {offsets = [0, 96], sizes = [8, 32], strides = [1, 1]} : vector<8x128xf32> to vector<8x32xf32>
    %39 = arith.mulf %36, %23 : vector<8x32xf32>
    %40 = arith.mulf %35, %37 : vector<8x32xf32>
    %41 = arith.addf %39, %40 : vector<8x32xf32>
    %42 = math.tanh %41 : vector<8x32xf32>
    %43 = arith.mulf %38, %42 : vector<8x32xf32>
    %44 = arith.index_cast %25 : i32 to index
    %c0_18 = arith.constant 0 : index
    %45 = vector.load %arg14[%44, %c0_18] : memref<64x32xf32, #tpu.memory_space<vmem>>, vector<8x32xf32>
    tpu.vector_store %arg14[%44, %c0_18], %43 {strides = array<i32>} : memref<64x32xf32, #tpu.memory_space<vmem>>, vector<8x32xf32>,
    %c1_i32 = arith.constant 1 : i32
    %c8_i32_19 = arith.constant 8 : i32
    %46 = arith.muli %c1_i32, %c8_i32_19 : i32
    %47 = tpu.assume_multiple %46, 8 : i32
    %48 = arith.index_cast %47 : i32 to index
    %c0_20 = arith.constant 0 : index
    %49 = vector.load %arg13[%48, %c0_20] : memref<64x128xf32, #tpu.memory_space<vmem>>, vector<8x128xf32>
    %50 = arith.truncf %43 : vector<8x32xf32> to vector<8x32xbf16>
    %cst_21 = arith.constant dense<0.000000e+00> : vector<8x128xf32>
    %51 = tpu.matmul %50, %21, %cst_21 {dimension_numbers = #tpu.dot_dimension_numbers<[1], [0], [0], [1], [0, 0, 1, 1], [], []>} : vector<8x32xbf16>, vector<32x128xbf16>, vector<8x128xf32> -> vector<8x128xf32>
    %52 = arith.addf %49, %51 : vector<8x128xf32>
    %53 = arith.mulf %52, %8 : vector<8x128xf32>
    %54 = math.tanh %53 : vector<8x128xf32>
    %55 = arith.mulf %54, %8 : vector<8x128xf32>
    %56 = arith.addf %55, %11 : vector<8x128xf32>
    %57 = vector.extract_strided_slice %56 {offsets = [0, 0], sizes = [8, 32], strides = [1, 1]} : vector<8x128xf32> to vector<8x32xf32>
    %58 = vector.extract_strided_slice %56 {offsets = [0, 32], sizes = [8, 32], strides = [1, 1]} : vector<8x128xf32> to vector<8x32xf32>
    %59 = vector.extract_strided_slice %56 {offsets = [0, 64], sizes = [8, 32], strides = [1, 1]} : vector<8x128xf32> to vector<8x32xf32>
    %60 = vector.extract_strided_slice %56 {offsets = [0, 96], sizes = [8, 32], strides = [1, 1]} : vector<8x128xf32> to vector<8x32xf32>
    %61 = arith.mulf %58, %41 : vector<8x32xf32>
    %62 = arith.mulf %57, %59 : vector<8x32xf32>
    %63 = arith.addf %61, %62 : vector<8x32xf32>
    %64 = math.tanh %63 : vector<8x32xf32>
    %65 = arith.mulf %60, %64 : vector<8x32xf32>
    %66 = arith.index_cast %47 : i32 to index
    %c0_22 = arith.constant 0 : index
    %67 = vector.load %arg14[%66, %c0_22] : memref<64x32xf32, #tpu.memory_space<vmem>>, vector<8x32xf32>
    tpu.vector_store %arg14[%66, %c0_22], %65 {strides = array<i32>} : memref<64x32xf32, #tpu.memory_space<vmem>>, vector<8x32xf32>,
    %c2_i32 = arith.constant 2 : i32
    %c8_i32_23 = arith.constant 8 : i32
    %68 = arith.muli %c2_i32, %c8_i32_23 : i32
    %69 = tpu.assume_multiple %68, 8 : i32
    %70 = arith.index_cast %69 : i32 to index
    %c0_24 = arith.constant 0 : index
    %71 = vector.load %arg13[%70, %c0_24] : memref<64x128xf32, #tpu.memory_space<vmem>>, vector<8x128xf32>
    %72 = arith.truncf %65 : vector<8x32xf32> to vector<8x32xbf16>
    %cst_25 = arith.constant dense<0.000000e+00> : vector<8x128xf32>
    %73 = tpu.matmul %72, %21, %cst_25 {dimension_numbers = #tpu.dot_dimension_numbers<[1], [0], [0], [1], [0, 0, 1, 1], [], []>} : vector<8x32xbf16>, vector<32x128xbf16>, vector<8x128xf32> -> vector<8x128xf32>
    %74 = arith.addf %71, %73 : vector<8x128xf32>
    %75 = arith.mulf %74, %8 : vector<8x128xf32>
    %76 = math.tanh %75 : vector<8x128xf32>
    %77 = arith.mulf %76, %8 : vector<8x128xf32>
    %78 = arith.addf %77, %11 : vector<8x128xf32>
    %79 = vector.extract_strided_slice %78 {offsets = [0, 0], sizes = [8, 32], strides = [1, 1]} : vector<8x128xf32> to vector<8x32xf32>
    %80 = vector.extract_strided_slice %78 {offsets = [0, 32], sizes = [8, 32], strides = [1, 1]} : vector<8x128xf32> to vector<8x32xf32>
    %81 = vector.extract_strided_slice %78 {offsets = [0, 64], sizes = [8, 32], strides = [1, 1]} : vector<8x128xf32> to vector<8x32xf32>
    %82 = vector.extract_strided_slice %78 {offsets = [0, 96], sizes = [8, 32], strides = [1, 1]} : vector<8x128xf32> to vector<8x32xf32>
    %83 = arith.mulf %80, %63 : vector<8x32xf32>
    %84 = arith.mulf %79, %81 : vector<8x32xf32>
    %85 = arith.addf %83, %84 : vector<8x32xf32>
    %86 = math.tanh %85 : vector<8x32xf32>
    %87 = arith.mulf %82, %86 : vector<8x32xf32>
    %88 = arith.index_cast %69 : i32 to index
    %c0_26 = arith.constant 0 : index
    %89 = vector.load %arg14[%88, %c0_26] : memref<64x32xf32, #tpu.memory_space<vmem>>, vector<8x32xf32>
    tpu.vector_store %arg14[%88, %c0_26], %87 {strides = array<i32>} : memref<64x32xf32, #tpu.memory_space<vmem>>, vector<8x32xf32>,
    %c3_i32 = arith.constant 3 : i32
    %c8_i32_27 = arith.constant 8 : i32
    %90 = arith.muli %c3_i32, %c8_i32_27 : i32
    %91 = tpu.assume_multiple %90, 8 : i32
    %92 = arith.index_cast %91 : i32 to index
    %c0_28 = arith.constant 0 : index
    %93 = vector.load %arg13[%92, %c0_28] : memref<64x128xf32, #tpu.memory_space<vmem>>, vector<8x128xf32>
    %94 = arith.truncf %87 : vector<8x32xf32> to vector<8x32xbf16>
    %cst_29 = arith.constant dense<0.000000e+00> : vector<8x128xf32>
    %95 = tpu.matmul %94, %21, %cst_29 {dimension_numbers = #tpu.dot_dimension_numbers<[1], [0], [0], [1], [0, 0, 1, 1], [], []>} : vector<8x32xbf16>, vector<32x128xbf16>, vector<8x128xf32> -> vector<8x128xf32>
    %96 = arith.addf %93, %95 : vector<8x128xf32>
    %97 = arith.mulf %96, %8 : vector<8x128xf32>
    %98 = math.tanh %97 : vector<8x128xf32>
    %99 = arith.mulf %98, %8 : vector<8x128xf32>
    %100 = arith.addf %99, %11 : vector<8x128xf32>
    %101 = vector.extract_strided_slice %100 {offsets = [0, 0], sizes = [8, 32], strides = [1, 1]} : vector<8x128xf32> to vector<8x32xf32>
    %102 = vector.extract_strided_slice %100 {offsets = [0, 32], sizes = [8, 32], strides = [1, 1]} : vector<8x128xf32> to vector<8x32xf32>
    %103 = vector.extract_strided_slice %100 {offsets = [0, 64], sizes = [8, 32], strides = [1, 1]} : vector<8x128xf32> to vector<8x32xf32>
    %104 = vector.extract_strided_slice %100 {offsets = [0, 96], sizes = [8, 32], strides = [1, 1]} : vector<8x128xf32> to vector<8x32xf32>
    %105 = arith.mulf %102, %85 : vector<8x32xf32>
    %106 = arith.mulf %101, %103 : vector<8x32xf32>
    %107 = arith.addf %105, %106 : vector<8x32xf32>
    %108 = math.tanh %107 : vector<8x32xf32>
    %109 = arith.mulf %104, %108 : vector<8x32xf32>
    %110 = arith.index_cast %91 : i32 to index
    %c0_30 = arith.constant 0 : index
    %111 = vector.load %arg14[%110, %c0_30] : memref<64x32xf32, #tpu.memory_space<vmem>>, vector<8x32xf32>
    tpu.vector_store %arg14[%110, %c0_30], %109 {strides = array<i32>} : memref<64x32xf32, #tpu.memory_space<vmem>>, vector<8x32xf32>,
    %c4_i32 = arith.constant 4 : i32
    %c8_i32_31 = arith.constant 8 : i32
    %112 = arith.muli %c4_i32, %c8_i32_31 : i32
    %113 = tpu.assume_multiple %112, 8 : i32
    %114 = arith.index_cast %113 : i32 to index
    %c0_32 = arith.constant 0 : index
    %115 = vector.load %arg13[%114, %c0_32] : memref<64x128xf32, #tpu.memory_space<vmem>>, vector<8x128xf32>
    %116 = arith.truncf %109 : vector<8x32xf32> to vector<8x32xbf16>
    %cst_33 = arith.constant dense<0.000000e+00> : vector<8x128xf32>
    %117 = tpu.matmul %116, %21, %cst_33 {dimension_numbers = #tpu.dot_dimension_numbers<[1], [0], [0], [1], [0, 0, 1, 1], [], []>} : vector<8x32xbf16>, vector<32x128xbf16>, vector<8x128xf32> -> vector<8x128xf32>
    %118 = arith.addf %115, %117 : vector<8x128xf32>
    %119 = arith.mulf %118, %8 : vector<8x128xf32>
    %120 = math.tanh %119 : vector<8x128xf32>
    %121 = arith.mulf %120, %8 : vector<8x128xf32>
    %122 = arith.addf %121, %11 : vector<8x128xf32>
    %123 = vector.extract_strided_slice %122 {offsets = [0, 0], sizes = [8, 32], strides = [1, 1]} : vector<8x128xf32> to vector<8x32xf32>
    %124 = vector.extract_strided_slice %122 {offsets = [0, 32], sizes = [8, 32], strides = [1, 1]} : vector<8x128xf32> to vector<8x32xf32>
    %125 = vector.extract_strided_slice %122 {offsets = [0, 64], sizes = [8, 32], strides = [1, 1]} : vector<8x128xf32> to vector<8x32xf32>
    %126 = vector.extract_strided_slice %122 {offsets = [0, 96], sizes = [8, 32], strides = [1, 1]} : vector<8x128xf32> to vector<8x32xf32>
    %127 = arith.mulf %124, %107 : vector<8x32xf32>
    %128 = arith.mulf %123, %125 : vector<8x32xf32>
    %129 = arith.addf %127, %128 : vector<8x32xf32>
    %130 = math.tanh %129 : vector<8x32xf32>
    %131 = arith.mulf %126, %130 : vector<8x32xf32>
    %132 = arith.index_cast %113 : i32 to index
    %c0_34 = arith.constant 0 : index
    %133 = vector.load %arg14[%132, %c0_34] : memref<64x32xf32, #tpu.memory_space<vmem>>, vector<8x32xf32>
    tpu.vector_store %arg14[%132, %c0_34], %131 {strides = array<i32>} : memref<64x32xf32, #tpu.memory_space<vmem>>, vector<8x32xf32>,
    %c5_i32 = arith.constant 5 : i32
    %c8_i32_35 = arith.constant 8 : i32
    %134 = arith.muli %c5_i32, %c8_i32_35 : i32
    %135 = tpu.assume_multiple %134, 8 : i32
    %136 = arith.index_cast %135 : i32 to index
    %c0_36 = arith.constant 0 : index
    %137 = vector.load %arg13[%136, %c0_36] : memref<64x128xf32, #tpu.memory_space<vmem>>, vector<8x128xf32>
    %138 = arith.truncf %131 : vector<8x32xf32> to vector<8x32xbf16>
    %cst_37 = arith.constant dense<0.000000e+00> : vector<8x128xf32>
    %139 = tpu.matmul %138, %21, %cst_37 {dimension_numbers = #tpu.dot_dimension_numbers<[1], [0], [0], [1], [0, 0, 1, 1], [], []>} : vector<8x32xbf16>, vector<32x128xbf16>, vector<8x128xf32> -> vector<8x128xf32>
    %140 = arith.addf %137, %139 : vector<8x128xf32>
    %141 = arith.mulf %140, %8 : vector<8x128xf32>
    %142 = math.tanh %141 : vector<8x128xf32>
    %143 = arith.mulf %142, %8 : vector<8x128xf32>
    %144 = arith.addf %143, %11 : vector<8x128xf32>
    %145 = vector.extract_strided_slice %144 {offsets = [0, 0], sizes = [8, 32], strides = [1, 1]} : vector<8x128xf32> to vector<8x32xf32>
    %146 = vector.extract_strided_slice %144 {offsets = [0, 32], sizes = [8, 32], strides = [1, 1]} : vector<8x128xf32> to vector<8x32xf32>
    %147 = vector.extract_strided_slice %144 {offsets = [0, 64], sizes = [8, 32], strides = [1, 1]} : vector<8x128xf32> to vector<8x32xf32>
    %148 = vector.extract_strided_slice %144 {offsets = [0, 96], sizes = [8, 32], strides = [1, 1]} : vector<8x128xf32> to vector<8x32xf32>
    %149 = arith.mulf %146, %129 : vector<8x32xf32>
    %150 = arith.mulf %145, %147 : vector<8x32xf32>
    %151 = arith.addf %149, %150 : vector<8x32xf32>
    %152 = math.tanh %151 : vector<8x32xf32>
    %153 = arith.mulf %148, %152 : vector<8x32xf32>
    %154 = arith.index_cast %135 : i32 to index
    %c0_38 = arith.constant 0 : index
    %155 = vector.load %arg14[%154, %c0_38] : memref<64x32xf32, #tpu.memory_space<vmem>>, vector<8x32xf32>
    tpu.vector_store %arg14[%154, %c0_38], %153 {strides = array<i32>} : memref<64x32xf32, #tpu.memory_space<vmem>>, vector<8x32xf32>,
    %c6_i32 = arith.constant 6 : i32
    %c8_i32_39 = arith.constant 8 : i32
    %156 = arith.muli %c6_i32, %c8_i32_39 : i32
    %157 = tpu.assume_multiple %156, 8 : i32
    %158 = arith.index_cast %157 : i32 to index
    %c0_40 = arith.constant 0 : index
    %159 = vector.load %arg13[%158, %c0_40] : memref<64x128xf32, #tpu.memory_space<vmem>>, vector<8x128xf32>
    %160 = arith.truncf %153 : vector<8x32xf32> to vector<8x32xbf16>
    %cst_41 = arith.constant dense<0.000000e+00> : vector<8x128xf32>
    %161 = tpu.matmul %160, %21, %cst_41 {dimension_numbers = #tpu.dot_dimension_numbers<[1], [0], [0], [1], [0, 0, 1, 1], [], []>} : vector<8x32xbf16>, vector<32x128xbf16>, vector<8x128xf32> -> vector<8x128xf32>
    %162 = arith.addf %159, %161 : vector<8x128xf32>
    %163 = arith.mulf %162, %8 : vector<8x128xf32>
    %164 = math.tanh %163 : vector<8x128xf32>
    %165 = arith.mulf %164, %8 : vector<8x128xf32>
    %166 = arith.addf %165, %11 : vector<8x128xf32>
    %167 = vector.extract_strided_slice %166 {offsets = [0, 0], sizes = [8, 32], strides = [1, 1]} : vector<8x128xf32> to vector<8x32xf32>
    %168 = vector.extract_strided_slice %166 {offsets = [0, 32], sizes = [8, 32], strides = [1, 1]} : vector<8x128xf32> to vector<8x32xf32>
    %169 = vector.extract_strided_slice %166 {offsets = [0, 64], sizes = [8, 32], strides = [1, 1]} : vector<8x128xf32> to vector<8x32xf32>
    %170 = vector.extract_strided_slice %166 {offsets = [0, 96], sizes = [8, 32], strides = [1, 1]} : vector<8x128xf32> to vector<8x32xf32>
    %171 = arith.mulf %168, %151 : vector<8x32xf32>
    %172 = arith.mulf %167, %169 : vector<8x32xf32>
    %173 = arith.addf %171, %172 : vector<8x32xf32>
    %174 = math.tanh %173 : vector<8x32xf32>
    %175 = arith.mulf %170, %174 : vector<8x32xf32>
    %176 = arith.index_cast %157 : i32 to index
    %c0_42 = arith.constant 0 : index
    %177 = vector.load %arg14[%176, %c0_42] : memref<64x32xf32, #tpu.memory_space<vmem>>, vector<8x32xf32>
    tpu.vector_store %arg14[%176, %c0_42], %175 {strides = array<i32>} : memref<64x32xf32, #tpu.memory_space<vmem>>, vector<8x32xf32>,
    %c7_i32 = arith.constant 7 : i32
    %c8_i32_43 = arith.constant 8 : i32
    %178 = arith.muli %c7_i32, %c8_i32_43 : i32
    %179 = tpu.assume_multiple %178, 8 : i32
    %180 = arith.index_cast %179 : i32 to index
    %c0_44 = arith.constant 0 : index
    %181 = vector.load %arg13[%180, %c0_44] : memref<64x128xf32, #tpu.memory_space<vmem>>, vector<8x128xf32>
    %182 = arith.truncf %175 : vector<8x32xf32> to vector<8x32xbf16>
    %cst_45 = arith.constant dense<0.000000e+00> : vector<8x128xf32>
    %183 = tpu.matmul %182, %21, %cst_45 {dimension_numbers = #tpu.dot_dimension_numbers<[1], [0], [0], [1], [0, 0, 1, 1], [], []>} : vector<8x32xbf16>, vector<32x128xbf16>, vector<8x128xf32> -> vector<8x128xf32>
    %184 = arith.addf %181, %183 : vector<8x128xf32>
    %185 = arith.mulf %184, %8 : vector<8x128xf32>
    %186 = math.tanh %185 : vector<8x128xf32>
    %187 = arith.mulf %186, %8 : vector<8x128xf32>
    %188 = arith.addf %187, %11 : vector<8x128xf32>
    %189 = vector.extract_strided_slice %188 {offsets = [0, 0], sizes = [8, 32], strides = [1, 1]} : vector<8x128xf32> to vector<8x32xf32>
    %190 = vector.extract_strided_slice %188 {offsets = [0, 32], sizes = [8, 32], strides = [1, 1]} : vector<8x128xf32> to vector<8x32xf32>
    %191 = vector.extract_strided_slice %188 {offsets = [0, 64], sizes = [8, 32], strides = [1, 1]} : vector<8x128xf32> to vector<8x32xf32>
    %192 = vector.extract_strided_slice %188 {offsets = [0, 96], sizes = [8, 32], strides = [1, 1]} : vector<8x128xf32> to vector<8x32xf32>
    %193 = arith.mulf %190, %173 : vector<8x32xf32>
    %194 = arith.mulf %189, %191 : vector<8x32xf32>
    %195 = arith.addf %193, %194 : vector<8x32xf32>
    %196 = math.tanh %195 : vector<8x32xf32>
    %197 = arith.mulf %192, %196 : vector<8x32xf32>
    %198 = arith.index_cast %179 : i32 to index
    %c0_46 = arith.constant 0 : index
    %199 = vector.load %arg14[%198, %c0_46] : memref<64x32xf32, #tpu.memory_space<vmem>>, vector<8x32xf32>
    tpu.vector_store %arg14[%198, %c0_46], %197 {strides = array<i32>} : memref<64x32xf32, #tpu.memory_space<vmem>>, vector<8x32xf32>,
    %c8_i32_47 = arith.constant 8 : i32
    %c0_48 = arith.constant 0 : index
    %c0_49 = arith.constant 0 : index
    %200 = vector.load %arg14[%c0_48, %c0_49] : memref<64x32xf32, #tpu.memory_space<vmem>>, vector<64x32xf32>
    %201 = arith.truncf %200 : vector<64x32xf32> to vector<64x32xbf16>
    %c0_50 = arith.constant 0 : index
    %c0_51 = arith.constant 0 : index
    %202 = vector.load %arg5[%c0_50, %c0_51] : memref<32x128xbf16, #tpu.memory_space<vmem>>, vector<32x128xbf16>
    %cst_52 = arith.constant dense<0.000000e+00> : vector<64x128xf32>
    %203 = tpu.matmul %201, %202, %cst_52 {dimension_numbers = #tpu.dot_dimension_numbers<[1], [0], [0], [1], [0, 0, 1, 1], [], []>} : vector<64x32xbf16>, vector<32x128xbf16>, vector<64x128xf32> -> vector<64x128xf32>
    %c0_53 = arith.constant 0 : index
    %c0_54 = arith.constant 0 : index
    %204 = vector.load %arg7[%c0_53, %c0_54] : memref<1x128xf32, #tpu.memory_space<vmem>>, vector<1x128xf32>
    %205 = vector.broadcast %204 : vector<1x128xf32> to vector<64x128xf32>
    %206 = arith.addf %203, %205 : vector<64x128xf32>
    %c0_55 = arith.constant 0 : index
    %c0_56 = arith.constant 0 : index
    %207 = vector.load %arg13[%c0_55, %c0_56] : memref<64x128xf32, #tpu.memory_space<vmem>>, vector<64x128xf32>
    tpu.vector_store %arg13[%c0_55, %c0_56], %206 {strides = array<i32>} : memref<64x128xf32, #tpu.memory_space<vmem>>, vector<64x128xf32>,
    %c0_57 = arith.constant 0 : index
    %c0_58 = arith.constant 0 : index
    %208 = vector.load %arg6[%c0_57, %c0_58] : memref<32x128xbf16, #tpu.memory_space<vmem>>, vector<32x128xbf16>
    %cst_59 = arith.constant 0.000000e+00 : f32
    %209 = vector.broadcast %cst_59 : f32 to vector<8x32xf32>
    %cst_60 = arith.constant 0.000000e+00 : f32
    %210 = vector.broadcast %cst_60 : f32 to vector<8x32xf32>
    %c0_i32_61 = arith.constant 0 : i32
    %c8_i32_62 = arith.constant 8 : i32
    %211 = arith.muli %c0_i32_61, %c8_i32_62 : i32
    %212 = tpu.assume_multiple %211, 8 : i32
    %213 = arith.index_cast %212 : i32 to index
    %c0_63 = arith.constant 0 : index
    %214 = vector.load %arg13[%213, %c0_63] : memref<64x128xf32, #tpu.memory_space<vmem>>, vector<8x128xf32>
    %215 = arith.truncf %209 : vector<8x32xf32> to vector<8x32xbf16>
    %cst_64 = arith.constant dense<0.000000e+00> : vector<8x128xf32>
    %216 = tpu.matmul %215, %208, %cst_64 {dimension_numbers = #tpu.dot_dimension_numbers<[1], [0], [0], [1], [0, 0, 1, 1], [], []>} : vector<8x32xbf16>, vector<32x128xbf16>, vector<8x128xf32> -> vector<8x128xf32>
    %217 = arith.addf %214, %216 : vector<8x128xf32>
    %218 = arith.mulf %217, %8 : vector<8x128xf32>
    %219 = math.tanh %218 : vector<8x128xf32>
    %220 = arith.mulf %219, %8 : vector<8x128xf32>
    %221 = arith.addf %220, %11 : vector<8x128xf32>
    %222 = vector.extract_strided_slice %221 {offsets = [0, 0], sizes = [8, 32], strides = [1, 1]} : vector<8x128xf32> to vector<8x32xf32>
    %223 = vector.extract_strided_slice %221 {offsets = [0, 32], sizes = [8, 32], strides = [1, 1]} : vector<8x128xf32> to vector<8x32xf32>
    %224 = vector.extract_strided_slice %221 {offsets = [0, 64], sizes = [8, 32], strides = [1, 1]} : vector<8x128xf32> to vector<8x32xf32>
    %225 = vector.extract_strided_slice %221 {offsets = [0, 96], sizes = [8, 32], strides = [1, 1]} : vector<8x128xf32> to vector<8x32xf32>
    %226 = arith.mulf %223, %210 : vector<8x32xf32>
    %227 = arith.mulf %222, %224 : vector<8x32xf32>
    %228 = arith.addf %226, %227 : vector<8x32xf32>
    %229 = math.tanh %228 : vector<8x32xf32>
    %230 = arith.mulf %225, %229 : vector<8x32xf32>
    %c1_i32_65 = arith.constant 1 : i32
    %c8_i32_66 = arith.constant 8 : i32
    %231 = arith.muli %c1_i32_65, %c8_i32_66 : i32
    %232 = tpu.assume_multiple %231, 8 : i32
    %233 = arith.index_cast %232 : i32 to index
    %c0_67 = arith.constant 0 : index
    %234 = vector.load %arg13[%233, %c0_67] : memref<64x128xf32, #tpu.memory_space<vmem>>, vector<8x128xf32>
    %235 = arith.truncf %230 : vector<8x32xf32> to vector<8x32xbf16>
    %cst_68 = arith.constant dense<0.000000e+00> : vector<8x128xf32>
    %236 = tpu.matmul %235, %208, %cst_68 {dimension_numbers = #tpu.dot_dimension_numbers<[1], [0], [0], [1], [0, 0, 1, 1], [], []>} : vector<8x32xbf16>, vector<32x128xbf16>, vector<8x128xf32> -> vector<8x128xf32>
    %237 = arith.addf %234, %236 : vector<8x128xf32>
    %238 = arith.mulf %237, %8 : vector<8x128xf32>
    %239 = math.tanh %238 : vector<8x128xf32>
    %240 = arith.mulf %239, %8 : vector<8x128xf32>
    %241 = arith.addf %240, %11 : vector<8x128xf32>
    %242 = vector.extract_strided_slice %241 {offsets = [0, 0], sizes = [8, 32], strides = [1, 1]} : vector<8x128xf32> to vector<8x32xf32>
    %243 = vector.extract_strided_slice %241 {offsets = [0, 32], sizes = [8, 32], strides = [1, 1]} : vector<8x128xf32> to vector<8x32xf32>
    %244 = vector.extract_strided_slice %241 {offsets = [0, 64], sizes = [8, 32], strides = [1, 1]} : vector<8x128xf32> to vector<8x32xf32>
    %245 = vector.extract_strided_slice %241 {offsets = [0, 96], sizes = [8, 32], strides = [1, 1]} : vector<8x128xf32> to vector<8x32xf32>
    %246 = arith.mulf %243, %228 : vector<8x32xf32>
    %247 = arith.mulf %242, %244 : vector<8x32xf32>
    %248 = arith.addf %246, %247 : vector<8x32xf32>
    %249 = math.tanh %248 : vector<8x32xf32>
    %250 = arith.mulf %245, %249 : vector<8x32xf32>
    %c2_i32_69 = arith.constant 2 : i32
    %c8_i32_70 = arith.constant 8 : i32
    %251 = arith.muli %c2_i32_69, %c8_i32_70 : i32
    %252 = tpu.assume_multiple %251, 8 : i32
    %253 = arith.index_cast %252 : i32 to index
    %c0_71 = arith.constant 0 : index
    %254 = vector.load %arg13[%253, %c0_71] : memref<64x128xf32, #tpu.memory_space<vmem>>, vector<8x128xf32>
    %255 = arith.truncf %250 : vector<8x32xf32> to vector<8x32xbf16>
    %cst_72 = arith.constant dense<0.000000e+00> : vector<8x128xf32>
    %256 = tpu.matmul %255, %208, %cst_72 {dimension_numbers = #tpu.dot_dimension_numbers<[1], [0], [0], [1], [0, 0, 1, 1], [], []>} : vector<8x32xbf16>, vector<32x128xbf16>, vector<8x128xf32> -> vector<8x128xf32>
    %257 = arith.addf %254, %256 : vector<8x128xf32>
    %258 = arith.mulf %257, %8 : vector<8x128xf32>
    %259 = math.tanh %258 : vector<8x128xf32>
    %260 = arith.mulf %259, %8 : vector<8x128xf32>
    %261 = arith.addf %260, %11 : vector<8x128xf32>
    %262 = vector.extract_strided_slice %261 {offsets = [0, 0], sizes = [8, 32], strides = [1, 1]} : vector<8x128xf32> to vector<8x32xf32>
    %263 = vector.extract_strided_slice %261 {offsets = [0, 32], sizes = [8, 32], strides = [1, 1]} : vector<8x128xf32> to vector<8x32xf32>
    %264 = vector.extract_strided_slice %261 {offsets = [0, 64], sizes = [8, 32], strides = [1, 1]} : vector<8x128xf32> to vector<8x32xf32>
    %265 = vector.extract_strided_slice %261 {offsets = [0, 96], sizes = [8, 32], strides = [1, 1]} : vector<8x128xf32> to vector<8x32xf32>
    %266 = arith.mulf %263, %248 : vector<8x32xf32>
    %267 = arith.mulf %262, %264 : vector<8x32xf32>
    %268 = arith.addf %266, %267 : vector<8x32xf32>
    %269 = math.tanh %268 : vector<8x32xf32>
    %270 = arith.mulf %265, %269 : vector<8x32xf32>
    %c3_i32_73 = arith.constant 3 : i32
    %c8_i32_74 = arith.constant 8 : i32
    %271 = arith.muli %c3_i32_73, %c8_i32_74 : i32
    %272 = tpu.assume_multiple %271, 8 : i32
    %273 = arith.index_cast %272 : i32 to index
    %c0_75 = arith.constant 0 : index
    %274 = vector.load %arg13[%273, %c0_75] : memref<64x128xf32, #tpu.memory_space<vmem>>, vector<8x128xf32>
    %275 = arith.truncf %270 : vector<8x32xf32> to vector<8x32xbf16>
    %cst_76 = arith.constant dense<0.000000e+00> : vector<8x128xf32>
    %276 = tpu.matmul %275, %208, %cst_76 {dimension_numbers = #tpu.dot_dimension_numbers<[1], [0], [0], [1], [0, 0, 1, 1], [], []>} : vector<8x32xbf16>, vector<32x128xbf16>, vector<8x128xf32> -> vector<8x128xf32>
    %277 = arith.addf %274, %276 : vector<8x128xf32>
    %278 = arith.mulf %277, %8 : vector<8x128xf32>
    %279 = math.tanh %278 : vector<8x128xf32>
    %280 = arith.mulf %279, %8 : vector<8x128xf32>
    %281 = arith.addf %280, %11 : vector<8x128xf32>
    %282 = vector.extract_strided_slice %281 {offsets = [0, 0], sizes = [8, 32], strides = [1, 1]} : vector<8x128xf32> to vector<8x32xf32>
    %283 = vector.extract_strided_slice %281 {offsets = [0, 32], sizes = [8, 32], strides = [1, 1]} : vector<8x128xf32> to vector<8x32xf32>
    %284 = vector.extract_strided_slice %281 {offsets = [0, 64], sizes = [8, 32], strides = [1, 1]} : vector<8x128xf32> to vector<8x32xf32>
    %285 = vector.extract_strided_slice %281 {offsets = [0, 96], sizes = [8, 32], strides = [1, 1]} : vector<8x128xf32> to vector<8x32xf32>
    %286 = arith.mulf %283, %268 : vector<8x32xf32>
    %287 = arith.mulf %282, %284 : vector<8x32xf32>
    %288 = arith.addf %286, %287 : vector<8x32xf32>
    %289 = math.tanh %288 : vector<8x32xf32>
    %290 = arith.mulf %285, %289 : vector<8x32xf32>
    %c4_i32_77 = arith.constant 4 : i32
    %c8_i32_78 = arith.constant 8 : i32
    %291 = arith.muli %c4_i32_77, %c8_i32_78 : i32
    %292 = tpu.assume_multiple %291, 8 : i32
    %293 = arith.index_cast %292 : i32 to index
    %c0_79 = arith.constant 0 : index
    %294 = vector.load %arg13[%293, %c0_79] : memref<64x128xf32, #tpu.memory_space<vmem>>, vector<8x128xf32>
    %295 = arith.truncf %290 : vector<8x32xf32> to vector<8x32xbf16>
    %cst_80 = arith.constant dense<0.000000e+00> : vector<8x128xf32>
    %296 = tpu.matmul %295, %208, %cst_80 {dimension_numbers = #tpu.dot_dimension_numbers<[1], [0], [0], [1], [0, 0, 1, 1], [], []>} : vector<8x32xbf16>, vector<32x128xbf16>, vector<8x128xf32> -> vector<8x128xf32>
    %297 = arith.addf %294, %296 : vector<8x128xf32>
    %298 = arith.mulf %297, %8 : vector<8x128xf32>
    %299 = math.tanh %298 : vector<8x128xf32>
    %300 = arith.mulf %299, %8 : vector<8x128xf32>
    %301 = arith.addf %300, %11 : vector<8x128xf32>
    %302 = vector.extract_strided_slice %301 {offsets = [0, 0], sizes = [8, 32], strides = [1, 1]} : vector<8x128xf32> to vector<8x32xf32>
    %303 = vector.extract_strided_slice %301 {offsets = [0, 32], sizes = [8, 32], strides = [1, 1]} : vector<8x128xf32> to vector<8x32xf32>
    %304 = vector.extract_strided_slice %301 {offsets = [0, 64], sizes = [8, 32], strides = [1, 1]} : vector<8x128xf32> to vector<8x32xf32>
    %305 = vector.extract_strided_slice %301 {offsets = [0, 96], sizes = [8, 32], strides = [1, 1]} : vector<8x128xf32> to vector<8x32xf32>
    %306 = arith.mulf %303, %288 : vector<8x32xf32>
    %307 = arith.mulf %302, %304 : vector<8x32xf32>
    %308 = arith.addf %306, %307 : vector<8x32xf32>
    %309 = math.tanh %308 : vector<8x32xf32>
    %310 = arith.mulf %305, %309 : vector<8x32xf32>
    %c5_i32_81 = arith.constant 5 : i32
    %c8_i32_82 = arith.constant 8 : i32
    %311 = arith.muli %c5_i32_81, %c8_i32_82 : i32
    %312 = tpu.assume_multiple %311, 8 : i32
    %313 = arith.index_cast %312 : i32 to index
    %c0_83 = arith.constant 0 : index
    %314 = vector.load %arg13[%313, %c0_83] : memref<64x128xf32, #tpu.memory_space<vmem>>, vector<8x128xf32>
    %315 = arith.truncf %310 : vector<8x32xf32> to vector<8x32xbf16>
    %cst_84 = arith.constant dense<0.000000e+00> : vector<8x128xf32>
    %316 = tpu.matmul %315, %208, %cst_84 {dimension_numbers = #tpu.dot_dimension_numbers<[1], [0], [0], [1], [0, 0, 1, 1], [], []>} : vector<8x32xbf16>, vector<32x128xbf16>, vector<8x128xf32> -> vector<8x128xf32>
    %317 = arith.addf %314, %316 : vector<8x128xf32>
    %318 = arith.mulf %317, %8 : vector<8x128xf32>
    %319 = math.tanh %318 : vector<8x128xf32>
    %320 = arith.mulf %319, %8 : vector<8x128xf32>
    %321 = arith.addf %320, %11 : vector<8x128xf32>
    %322 = vector.extract_strided_slice %321 {offsets = [0, 0], sizes = [8, 32], strides = [1, 1]} : vector<8x128xf32> to vector<8x32xf32>
    %323 = vector.extract_strided_slice %321 {offsets = [0, 32], sizes = [8, 32], strides = [1, 1]} : vector<8x128xf32> to vector<8x32xf32>
    %324 = vector.extract_strided_slice %321 {offsets = [0, 64], sizes = [8, 32], strides = [1, 1]} : vector<8x128xf32> to vector<8x32xf32>
    %325 = vector.extract_strided_slice %321 {offsets = [0, 96], sizes = [8, 32], strides = [1, 1]} : vector<8x128xf32> to vector<8x32xf32>
    %326 = arith.mulf %323, %308 : vector<8x32xf32>
    %327 = arith.mulf %322, %324 : vector<8x32xf32>
    %328 = arith.addf %326, %327 : vector<8x32xf32>
    %329 = math.tanh %328 : vector<8x32xf32>
    %330 = arith.mulf %325, %329 : vector<8x32xf32>
    %c6_i32_85 = arith.constant 6 : i32
    %c8_i32_86 = arith.constant 8 : i32
    %331 = arith.muli %c6_i32_85, %c8_i32_86 : i32
    %332 = tpu.assume_multiple %331, 8 : i32
    %333 = arith.index_cast %332 : i32 to index
    %c0_87 = arith.constant 0 : index
    %334 = vector.load %arg13[%333, %c0_87] : memref<64x128xf32, #tpu.memory_space<vmem>>, vector<8x128xf32>
    %335 = arith.truncf %330 : vector<8x32xf32> to vector<8x32xbf16>
    %cst_88 = arith.constant dense<0.000000e+00> : vector<8x128xf32>
    %336 = tpu.matmul %335, %208, %cst_88 {dimension_numbers = #tpu.dot_dimension_numbers<[1], [0], [0], [1], [0, 0, 1, 1], [], []>} : vector<8x32xbf16>, vector<32x128xbf16>, vector<8x128xf32> -> vector<8x128xf32>
    %337 = arith.addf %334, %336 : vector<8x128xf32>
    %338 = arith.mulf %337, %8 : vector<8x128xf32>
    %339 = math.tanh %338 : vector<8x128xf32>
    %340 = arith.mulf %339, %8 : vector<8x128xf32>
    %341 = arith.addf %340, %11 : vector<8x128xf32>
    %342 = vector.extract_strided_slice %341 {offsets = [0, 0], sizes = [8, 32], strides = [1, 1]} : vector<8x128xf32> to vector<8x32xf32>
    %343 = vector.extract_strided_slice %341 {offsets = [0, 32], sizes = [8, 32], strides = [1, 1]} : vector<8x128xf32> to vector<8x32xf32>
    %344 = vector.extract_strided_slice %341 {offsets = [0, 64], sizes = [8, 32], strides = [1, 1]} : vector<8x128xf32> to vector<8x32xf32>
    %345 = vector.extract_strided_slice %341 {offsets = [0, 96], sizes = [8, 32], strides = [1, 1]} : vector<8x128xf32> to vector<8x32xf32>
    %346 = arith.mulf %343, %328 : vector<8x32xf32>
    %347 = arith.mulf %342, %344 : vector<8x32xf32>
    %348 = arith.addf %346, %347 : vector<8x32xf32>
    %349 = math.tanh %348 : vector<8x32xf32>
    %350 = arith.mulf %345, %349 : vector<8x32xf32>
    %c7_i32_89 = arith.constant 7 : i32
    %c8_i32_90 = arith.constant 8 : i32
    %351 = arith.muli %c7_i32_89, %c8_i32_90 : i32
    %352 = tpu.assume_multiple %351, 8 : i32
    %353 = arith.index_cast %352 : i32 to index
    %c0_91 = arith.constant 0 : index
    %354 = vector.load %arg13[%353, %c0_91] : memref<64x128xf32, #tpu.memory_space<vmem>>, vector<8x128xf32>
    %355 = arith.truncf %350 : vector<8x32xf32> to vector<8x32xbf16>
    %cst_92 = arith.constant dense<0.000000e+00> : vector<8x128xf32>
    %356 = tpu.matmul %355, %208, %cst_92 {dimension_numbers = #tpu.dot_dimension_numbers<[1], [0], [0], [1], [0, 0, 1, 1], [], []>} : vector<8x32xbf16>, vector<32x128xbf16>, vector<8x128xf32> -> vector<8x128xf32>
    %357 = arith.addf %354, %356 : vector<8x128xf32>
    %358 = arith.mulf %357, %8 : vector<8x128xf32>
    %359 = math.tanh %358 : vector<8x128xf32>
    %360 = arith.mulf %359, %8 : vector<8x128xf32>
    %361 = arith.addf %360, %11 : vector<8x128xf32>
    %362 = vector.extract_strided_slice %361 {offsets = [0, 0], sizes = [8, 32], strides = [1, 1]} : vector<8x128xf32> to vector<8x32xf32>
    %363 = vector.extract_strided_slice %361 {offsets = [0, 32], sizes = [8, 32], strides = [1, 1]} : vector<8x128xf32> to vector<8x32xf32>
    %364 = vector.extract_strided_slice %361 {offsets = [0, 64], sizes = [8, 32], strides = [1, 1]} : vector<8x128xf32> to vector<8x32xf32>
    %365 = vector.extract_strided_slice %361 {offsets = [0, 96], sizes = [8, 32], strides = [1, 1]} : vector<8x128xf32> to vector<8x32xf32>
    %366 = arith.mulf %363, %348 : vector<8x32xf32>
    %367 = arith.mulf %362, %364 : vector<8x32xf32>
    %368 = arith.addf %366, %367 : vector<8x32xf32>
    %369 = math.tanh %368 : vector<8x32xf32>
    %370 = arith.mulf %365, %369 : vector<8x32xf32>
    %c8_i32_93 = arith.constant 8 : i32
    %cst_94 = arith.constant dense<0.000000e+00> : vector<8xf32>
    %371 = vector.multi_reduction <add>, %370, %cst_94 [1] : vector<8x32xf32> to vector<8xf32>
    %372 = vector.shape_cast %371 : vector<8xf32> to vector<8x1xf32>
    %cst_95 = arith.constant 3.200000e+01 : f32
    %373 = vector.broadcast %cst_95 : f32 to vector<8x1xf32>
    %374 = arith.divf %372, %373 : vector<8x1xf32>
    %375 = vector.broadcast %374 : vector<8x1xf32> to vector<8x32xf32>
    %376 = arith.subf %370, %375 : vector<8x32xf32>
    %377 = arith.mulf %376, %376 : vector<8x32xf32>
    %cst_96 = arith.constant dense<0.000000e+00> : vector<8xf32>
    %378 = vector.multi_reduction <add>, %377, %cst_96 [1] : vector<8x32xf32> to vector<8xf32>
    %379 = vector.shape_cast %378 : vector<8xf32> to vector<8x1xf32>
    %cst_97 = arith.constant 3.200000e+01 : f32
    %380 = vector.broadcast %cst_97 : f32 to vector<8x1xf32>
    %381 = arith.divf %379, %380 : vector<8x1xf32>
    %382 = vector.broadcast %374 : vector<8x1xf32> to vector<8x32xf32>
    %383 = arith.subf %370, %382 : vector<8x32xf32>
    %cst_98 = arith.constant 9.99999974E-6 : f32
    %384 = vector.broadcast %cst_98 : f32 to vector<8x1xf32>
    %385 = arith.addf %381, %384 : vector<8x1xf32>
    %386 = math.rsqrt %385 : vector<8x1xf32>
    %387 = vector.broadcast %386 : vector<8x1xf32> to vector<8x32xf32>
    %388 = arith.mulf %383, %387 : vector<8x32xf32>
    %c0_99 = arith.constant 0 : index
    %c0_100 = arith.constant 0 : index
    %389 = vector.load %arg8[%c0_99, %c0_100] : memref<1x32xf32, #tpu.memory_space<vmem>>, vector<1x32xf32>
    %390 = vector.broadcast %389 : vector<1x32xf32> to vector<8x32xf32>
    %391 = arith.mulf %388, %390 : vector<8x32xf32>
    %c0_101 = arith.constant 0 : index
    %c0_102 = arith.constant 0 : index
    %392 = vector.load %arg9[%c0_101, %c0_102] : memref<1x32xf32, #tpu.memory_space<vmem>>, vector<1x32xf32>
    %393 = vector.broadcast %392 : vector<1x32xf32> to vector<8x32xf32>
    %394 = arith.addf %391, %393 : vector<8x32xf32>
    %395 = arith.truncf %394 : vector<8x32xf32> to vector<8x32xbf16>
    %c0_103 = arith.constant 0 : index
    %c0_104 = arith.constant 0 : index
    %396 = vector.load %arg10[%c0_103, %c0_104] : memref<32x4xbf16, #tpu.memory_space<vmem>>, vector<32x4xbf16>
    %cst_105 = arith.constant dense<0.000000e+00> : vector<8x4xf32>
    %397 = tpu.matmul %395, %396, %cst_105 {dimension_numbers = #tpu.dot_dimension_numbers<[1], [0], [0], [1], [0, 0, 1, 1], [], []>} : vector<8x32xbf16>, vector<32x4xbf16>, vector<8x4xf32> -> vector<8x4xf32>
    %c0_106 = arith.constant 0 : index
    %c0_107 = arith.constant 0 : index
    %398 = vector.load %arg11[%c0_106, %c0_107] : memref<1x4xf32, #tpu.memory_space<vmem>>, vector<1x4xf32>
    %399 = vector.broadcast %398 : vector<1x4xf32> to vector<8x4xf32>
    %400 = arith.addf %397, %399 : vector<8x4xf32>
    %c0_108 = arith.constant 0 : index
    %c0_109 = arith.constant 0 : index
    %401 = vector.load %arg12[%c0_108, %c0_109] : memref<8x4xf32, #tpu.memory_space<vmem>>, vector<8x4xf32>
    tpu.vector_store %arg12[%c0_108, %c0_109], %400 {strides = array<i32>} : memref<8x4xf32, #tpu.memory_space<vmem>>, vector<8x4xf32>,
    return
  }
  func.func @transform_0(%arg0: i32) -> (i32, i32, i32) {
    %c0_i32 = arith.constant 0 : i32
    %c0_i32_0 = arith.constant 0 : i32
    %c0_i32_1 = arith.constant 0 : i32
    return %c0_i32, %arg0, %c0_i32_0 : i32, i32, i32
  }
  func.func @transform_1(%arg0: i32) -> (i32, i32) {
    %c0_i32 = arith.constant 0 : i32
    %c0_i32_0 = arith.constant 0 : i32
    %c0_i32_1 = arith.constant 0 : i32
    return %c0_i32, %c0_i32_0 : i32, i32
  }
  func.func @transform_2(%arg0: i32) -> (i32, i32) {
    %c0_i32 = arith.constant 0 : i32
    %c0_i32_0 = arith.constant 0 : i32
    %c0_i32_1 = arith.constant 0 : i32
    return %c0_i32, %c0_i32_0 : i32, i32
  }
  func.func @transform_3(%arg0: i32) -> (i32, i32) {
    %c0_i32 = arith.constant 0 : i32
    %c0_i32_0 = arith.constant 0 : i32
    %c0_i32_1 = arith.constant 0 : i32
    return %c0_i32, %c0_i32_0 : i32, i32
  }
  func.func @transform_4(%arg0: i32) -> (i32, i32) {
    %c0_i32 = arith.constant 0 : i32
    %c0_i32_0 = arith.constant 0 : i32
    %c0_i32_1 = arith.constant 0 : i32
    return %c0_i32, %c0_i32_0 : i32, i32
  }
  func.func @transform_5(%arg0: i32) -> (i32, i32) {
    %c0_i32 = arith.constant 0 : i32
    %c0_i32_0 = arith.constant 0 : i32
    %c0_i32_1 = arith.constant 0 : i32
    return %c0_i32, %c0_i32_0 : i32, i32
  }
  func.func @transform_6(%arg0: i32) -> (i32, i32) {
    %c0_i32 = arith.constant 0 : i32
    %c0_i32_0 = arith.constant 0 : i32
    %c0_i32_1 = arith.constant 0 : i32
    return %c0_i32, %c0_i32_0 : i32, i32
  }
  func.func @transform_7(%arg0: i32) -> (i32, i32) {
    %c0_i32 = arith.constant 0 : i32
    %c0_i32_0 = arith.constant 0 : i32
    %c0_i32_1 = arith.constant 0 : i32
    return %c0_i32, %c0_i32_0 : i32, i32
  }
  func.func @transform_8(%arg0: i32) -> (i32, i32) {
    %c0_i32 = arith.constant 0 : i32
    %c0_i32_0 = arith.constant 0 : i32
    %c0_i32_1 = arith.constant 0 : i32
    return %c0_i32, %c0_i32_0 : i32, i32
  }
  func.func @transform_9(%arg0: i32) -> (i32, i32) {
    %c0_i32 = arith.constant 0 : i32
    %c0_i32_0 = arith.constant 0 : i32
    %c0_i32_1 = arith.constant 0 : i32
    return %c0_i32, %c0_i32_0 : i32, i32
  }
  func.func @transform_10(%arg0: i32) -> (i32, i32) {
    %c0_i32 = arith.constant 0 : i32
    %c0_i32_0 = arith.constant 0 : i32
    %c0_i32_1 = arith.constant 0 : i32
    return %c0_i32, %c0_i32_0 : i32, i32
  }
  func.func @transform_11(%arg0: i32) -> (i32, i32) {
    %c0_i32 = arith.constant 0 : i32
    %c0_i32_0 = arith.constant 0 : i32
    return %arg0, %c0_i32 : i32, i32
  }
}

</mosaic_0001>

<bundles_post_ra>
// kernel: tpu_custom_call.1
= control target key start
LH: loop header
LB: loop body
LE: loop exit
PB: predicated region body
PF: predicated region fallthrough
CT: control target
= control target key end

     0   :  { %16 = vsyncpa [#allocation5], 0  ;;  %s2565_s0 = inlined_call_operand.hbm [shape: f32[8,8,16], index: 0, kind: input, shape index: {}]   ;;  %s2566_s1 = inlined_call_operand.hbm [shape: bf16[16,128], index: 1, kind: input, shape index: {}]   ;;  %s2567_s2 = inlined_call_operand.vmem [shape: bf16[32,128], index: 2, kind: input, shape index: {}]   ;;  %s2568_s3 = inlined_call_operand.vmem [shape: f32[1,128], index: 3, kind: input, shape index: {}]   ;;  %s2569_s4 = inlined_call_operand.vmem [shape: bf16[32,128], index: 4, kind: input, shape index: {}]   ;;  %s2570_s5 = inlined_call_operand.hbm [shape: bf16[32,128], index: 5, kind: input, shape index: {}]   ;;  %s2571_s6 = inlined_call_operand.vmem [shape: f32[1,128], index: 6, kind: input, shape index: {}]   ;;  %s2572_s7 = inlined_call_operand.vmem [shape: f32[1,32], index: 7, kind: input, shape index: {}]   ;;  %s2573_s8 = inlined_call_operand.vmem [shape: f32[1,32], index: 8, kind: input, shape index: {}]   ;;  %s2574_s9 = inlined_call_operand.vmem [shape: bf16[32,4], index: 9, kind: input, shape index: {}]   ;;  %s2575_s10 = inlined_call_operand.vmem [shape: f32[1,4], index: 10, kind: input, shape index: {}]   ;;  %s2576_s11 = inlined_call_operand.vmem [shape: f32[8,4], index: 11, kind: output, shape index: {}]  }
   0x1   :  { %17 = vsyncpa [#allocation7], 0  ;;  %s2051_s17 = smov [#allocation6]   ;;  %s1981_s21 = scalar_lea.hbm %s2566_s1, 128 }
   0x2   :  { %s35_s18 = sshll.u32 %s2051_s17, 4  ;;  %p1982_p0 = scmp.ne.s32.totalorder %s2566_s1, %s1981_s21  ;;  %s36_s18 = int_to_ptr.vmem [resolvable:$true] %s35_s18 }
   0x3   :  { %p1985_p1 = scmp.lt.u32.totalorder %s1981_s21, %s2566_s1 }
   0x5   :  { %p1987_p2 = pnand %p1985_p1, %p1982_p0 }
   0x7   :  { %1990 = shalt.err (!%p1987_p2)
}
   0x8   :  { %s1991_s26 = scalar_lea.vmem %s36_s18, 128  ;;  %p1996_p4 = scmp.lt.s32.totalorder %s36_s18, %s36_s18 }
   0x9   :  { %p1992_p3 = scmp.ne.s32.totalorder %s36_s18, %s1991_s26  ;;  %p1997_p5 = scmp.lt.s32.totalorder %s1991_s26, %s1991_s26 }
   0xb   :  { %p1998_p6 = por %p1997_p5, %p1996_p4 }
   0xd   :  { %p1999_p7 = pnand %p1998_p6, %p1992_p3 }
   0xf   :  { %2002 = shalt.err (!%p1999_p7)
}
  0x10   :  { %s2052_s27 = smov 64   ;;  %s2053_s28 = smov 4  }
  0x11   :  { %41 = dma.hbm_to_vmem [thread:$0]  %s2566_s1, 128, %s36_s18, [#allocation7], %s2052_s27, %s2052_s27, %s2053_s28  }
  0x12   :  { %s2054_s12 = smov [#allocation4]   ;;  %s2003_s16 = scalar_lea.hbm %s2565_s0, 1024 }
  0x13   :  { %s23_s13 = sshll.u32 %s2054_s12, 4  ;;  %p2004_p8 = scmp.ne.s32.totalorder %s2565_s0, %s2003_s16  ;;  %s24_s13 = int_to_ptr.vmem [resolvable:$true] %s23_s13 }
  0x14   :  { %p2007_p9 = scmp.lt.u32.totalorder %s2003_s16, %s2565_s0 }
  0x16   :  { %p2009_p10 = pnand %p2007_p9, %p2004_p8 }
  0x18   :  { %2012 = shalt.err (!%p2009_p10)
}
  0x19   :  { %s2013_s22 = scalar_lea.vmem %s24_s13, 1024  ;;  %p2018_p12 = scmp.lt.s32.totalorder %s24_s13, %s24_s13 }
  0x1a   :  { %p2014_p11 = scmp.ne.s32.totalorder %s24_s13, %s2013_s22  ;;  %p2019_p13 = scmp.lt.s32.totalorder %s2013_s22, %s2013_s22 }
  0x1c   :  { %p2020_p0 = por %p2019_p13, %p2018_p12 }
  0x1e   :  { %p2021_p1 = pnand %p2020_p0, %p2014_p11 }
  0x20   :  { %2024 = shalt.err (!%p2021_p1)
}
  0x21   :  { %s2055_s1 = smov 128   ;;  %s2056_s18 = smov 8  }
  0x22   :  { %29 = dma.hbm_to_vmem [thread:$0]  %s2565_s0, 1024, %s24_s13, [#allocation5], %s2055_s1, %s2055_s1, %s2056_s18  }
  0x23   :  { %s2057_s25 = smov [#allocation8]   ;;  %s2025_s12 = scalar_lea.hbm %s2570_s5, 256 }
  0x24   :  { %s53_s26 = sshll.u32 %s2057_s25, 4  ;;  %p2026_p2 = scmp.ne.s32.totalorder %s2570_s5, %s2025_s12  ;;  %s54_s26 = int_to_ptr.vmem [resolvable:$true] %s53_s26 }
  0x25   :  { %p2029_p3 = scmp.lt.u32.totalorder %s2025_s12, %s2570_s5 }
  0x27   :  { %p2031_p4 = pnand %p2029_p3, %p2026_p2 }
  0x29   :  { %2034 = shalt.err (!%p2031_p4)
}
  0x2a   :  { %s2035_s19 = scalar_lea.vmem %s54_s26, 256  ;;  %p2040_p6 = scmp.lt.s32.totalorder %s54_s26, %s54_s26 }
  0x2b   :  { %p2036_p5 = scmp.ne.s32.totalorder %s54_s26, %s2035_s19  ;;  %p2041_p7 = scmp.lt.s32.totalorder %s2035_s19, %s2035_s19 }
  0x2d   :  { %p2042_p8 = por %p2041_p7, %p2040_p6 }
  0x2f   :  { %p2043_p9 = pnand %p2042_p8, %p2036_p5 }
  0x31   :  { %2046 = shalt.err (!%p2043_p9)
}
  0x32   :  { %59 = dma.hbm_to_vmem [thread:$0]  %s2570_s5, 256, %s54_s26, [#allocation7], %s2052_s27, %s2052_s27, %s2053_s28  }
  0x33   :  { %2047 = dma.done.wait [#allocation5], 1024  }
  0x34   :  { %2048 = vsyncadd [#allocation5], 4294966272 }
  0x35   :  { %2049 = dma.done.wait [#allocation7], 384  }
  0x36   :  { %2050 = vsyncadd [#allocation7], 4294966912  ;;  %v2058_v0 = vmov 0.0   ;;  %vm2059_vm0 = vmmov 0   ;;  %v1906_v1 = vld [vmem:[#allocation6] sm:$0xff]   ;;  %v88_v4 = vld [vmem:[#allocation4 + $0x8] sm:$0xff]  ;;  %v80_v11 = vlaneseq }
  0x37   :  { %1745 = vmatprep.subr.bf16.mxu1 %v2058_v0  ;;  %1749 = vmatprep.mubr.msk.bf16.mxu1 %vm2059_vm0, %v2058_v0  ;;  %v2172_v2 = vld [vmem:[%s2567_s2] sm:$0xff]   ;;  %vm114_vm1 = vcmask 130048   ;;  %v89_v5 = vld [vmem:[#allocation4 + $0x10] sm:$0xff]  ;;  %v90_v7 = vld [vmem:[#allocation4 + $0x18] sm:$0xff]  ;;  %v2060_v10 = vmov 0   ;;  %v2061_v19 = vmov 0.5  }
  0x38   :  { %1735 = vmatprep.subr.bf16.mxu0 %v1906_v1  ;;  %v87_v3 = vld [vmem:[#allocation4] sm:$0xff]  ;;  %1746 = vmatpush3.bf16.msra.mxu1 %v2172_v2  ;;  %v96_v8 = vpack.c.bf16 %v90_v7, %v89_v5  ;;  %v2179_v9 = vld [vmem:[%s2567_s2 + $0x8] sm:$0xff]   ;;  %v81_v12 = vand.u32 127, %v80_v11  ;;  %vm217_vm5 = vcmask 261120   ;;  %v93_v58 = vld [vmem:[#allocation4 + $0x30] sm:$0xff]  ;;  %s2063_s29 = smov 96  }
  0x39   :  { %1736 = vmatpush3.bf16.msra.mxu0 %v1906_v1  ;;  %v95_v6 = vpack.c.bf16 %v88_v4, %v87_v3  ;;  %1747 = vmatprep.subr.bf16.mxu1 %v2058_v0  ;;  %v2200_v13 = vld [vmem:[%s2568_s3] ss:$0 sm:$0xff]  ;;  %s2062_s3 = smov 32   ;;  %v92_v57 = vld [vmem:[#allocation4 + $0x28] sm:$0xff]  ;;  %v94_v60 = vld [vmem:[#allocation4 + $0x38] sm:$0xff]  ;;  %vm1628_vm6 = vcmask 31744  }
  0x3a   :  { %1761 = vmatprep.subr.bf16.mxu0 %v2058_v0  ;;  %vm82_vm2 = vcmp.ge.s32.totalorder %v81_v12, 64  ;;  %vm83_vm3 = vcmp.lt.s32.totalorder %v81_v12, 96  ;;  %v91_v56 = vld [vmem:[#allocation4 + $0x20] sm:$0xff]  ;;  %v98_v61 = vpack.c.bf16 %v94_v60, %v93_v58 }
  0x3b   :  { %1737 = vmatprep.mubr.msk.bf16.mxu0 %vm114_vm1, %v95_v6  ;;  %vm84_vm4 = vmand %vm82_vm2, %vm83_vm3  ;;  %v97_v59 = vpack.c.bf16 %v92_v57, %v91_v56 }
  0x3c   :  { %1738 = vmatmul.mubr.msk.bf16.vlgmr.msra.gmra.mrb[0].mxu0 %vm114_vm1, %v96_v8  ;;  %1748 = vmatpush3.bf16.msra.mxu1 %v2179_v9  ;;  %v2207_v20 = vsel %vm84_vm4, 1.0, %v2061_v19  ;;  %v2210_v28 = vsel %vm84_vm4, 0.0, %v2061_v19 }
  0x3d   :  { %1762 = vmatpush3.bf16.msra.mxu0 %v2172_v2  ;;  %1753 = vmatprep.subr.bf16.mxu1 %v2058_v0 }
  0x3e   :  { %1763 = vmatprep.subr.bf16.mxu0 %v2058_v0  ;;  %1741 = vmatprep.mubr.msk.bf16.mxu0 %vm114_vm1, %v97_v59 }
  0x3f   :  { %1750 = vmatmul.mubr.bf16.vlgmr.msra.gmra.mrb[0].mxu1 %v2060_v10 }
  0x40   :  { %1754 = vmatpush3.bf16.msra.mxu1 %v2172_v2  ;;  %1757 = vmatprep.mubr.msk.bf16.mxu1 %vm2059_vm0, %v2058_v0 }
  0x41   :  { %1755 = vmatprep.subr.bf16.mxu1 %v2058_v0  ;;  %1764 = vmatpush3.bf16.msra.mxu0 %v2179_v9 }
  0x42   :  { %1777 = vmatprep.subr.bf16.mxu0 %v2058_v0 }
  0x44   :  { %1756 = vmatpush3.bf16.msra.mxu1 %v2179_v9  ;;  %1742 = vmatmul.mubr.msk.bf16.gmra.mrb[4].mxu0 %vm114_vm1, %v98_v61 }
  0x45   :  { %1769 = vmatprep.subr.bf16.mxu1 %v2058_v0  ;;  %1765 = vmatprep.mubr.msk.bf16.mxu0 %vm2059_vm0, %v2058_v0 }
 0x10f   :  { %v2202_v14 = vpop.f32.mrb[0].mxu0 }
 0x110   :  { %v161_v15 = vpop.f32.mrb[1].mxu0  ;;  %v170_v11 = vadd.f32 %v2202_v14, %v2200_v13 }
 0x111   :  { %v162_v16 = vadd.f32 %v2200_v13, %v161_v15  ;;  %v2205_v17 = vpop.f32.mrb[2].mxu0 }
 0x112   :  { %v164_v18 = vpop.f32.mrb[3].mxu0  ;;  %v255_v21 = vpop.f32.mrb[0].mxu1 }
 0x113   :  { %v261_v22 = vadd.f32 %v255_v21, %v162_v16  ;;  %v1751_v23 = vpop.f32.mrb[1].mxu1  ;;  %v165_v41 = vadd.f32 %v2200_v13, %v164_v18 }
 0x114   :  { %v258_v24 = vpop.f32.mrb[2].mxu1 }
 0x115   :  { %v262_v25 = vmul.f32 %v261_v22, %v2207_v20  ;;  %v1752_v26 = vpop.f32.mrb[3].mxu1 }
 0x117   :  { %1915 = vtanh.f32 %v262_v25  ;;  %v2245_v4 = vpop.f32.mrb[4].mxu0 }
 0x118   :  { %v2247_v5 = vpop.f32.mrb[5].mxu0 }
 0x119   :  { %v2249_v6 = vpop.f32.mrb[6].mxu0 }
 0x11a   :  { %v2251_v7 = vpop.f32.mrb[7].mxu0 }
 0x121   :  { %v1916_v27 = vpop.eup %1915 }
 0x122   :  { %v264_v29 = vmul.f32 %v1916_v27, %v2207_v20 }
 0x124   :  { %v265_v30 = vadd.f32 %v264_v29, %v2210_v28 }
 0x126   :  { %268 = vrot.lane.b32.xlu0 %v265_v30, %s2052_s27  ;;  %v266_v33 = vmul.f32 0.0, %v265_v30 }
 0x198   :  { %v269_v31 = vpop.permute.xlu0 %268 }
 0x199   :  { %v271_v32 = vmul.f32 %v269_v31, %v265_v30 }
 0x19b   :  { %273 = vrot.lane.b32.xlu0 %v271_v32, %s2062_s3 }
 0x20d   :  { %v274_v34 = vpop.permute.xlu0 %273 }
 0x20e   :  { %v276_v35 = vadd.f32 %v274_v34, %v266_v33 }
 0x210   :  { %1917 = vtanh.f32 %v276_v35 }
 0x21a   :  { %v1918_v36 = vpop.eup %1917 }
 0x21b   :  { %279 = vrot.lane.b32.xlu1 %v1918_v36, %s2052_s27 }
 0x28d   :  { %v280_v37 = vpop.permute.xlu1 %279 }
 0x28e   :  { %v2217_v38 = vmul.f32 %v280_v37, %v265_v30 }
 0x290   :  { %v290_v39 = vpack.c.bf16 %v2217_v38, %v2217_v38 }
 0x292   :  { %292 = vrot.lane.b32.xlu1 %v290_v39, %s2062_s3 }
 0x304   :  { %v293_v40 = vpop.permute.xlu1 %292 }
 0x305   :  { %1758 = vmatmul.mubr.msk.bf16.vlgmr.msra.gmra.mrb[4].mxu1 %vm217_vm5, %v293_v40 }
 0x306   :  { %1770 = vmatpush3.bf16.msra.mxu1 %v2172_v2  ;;  %1773 = vmatprep.mubr.msk.bf16.mxu1 %vm2059_vm0, %v2058_v0 }
 0x307   :  { %1771 = vmatprep.subr.bf16.mxu1 %v2058_v0 }
 0x30a   :  { %1772 = vmatpush3.bf16.msra.mxu1 %v2179_v9 }
 0x30b   :  { %1785 = vmatprep.subr.bf16.mxu1 %v2058_v0 }
 0x3d8   :  { %v331_v42 = vpop.f32.mrb[4].mxu1 }
 0x3d9   :  { %v337_v43 = vadd.f32 %v331_v42, %v165_v41  ;;  %v1759_v44 = vpop.f32.mrb[5].mxu1 }
 0x3da   :  { %v334_v45 = vpop.f32.mrb[6].mxu1 }
 0x3db   :  { %v338_v46 = vmul.f32 %v337_v43, %v2207_v20  ;;  %v1760_v47 = vpop.f32.mrb[7].mxu1 }
 0x3dd   :  { %1919 = vtanh.f32 %v338_v46 }
 0x3e7   :  { %v1920_v48 = vpop.eup %1919 }
 0x3e8   :  { %v340_v49 = vmul.f32 %v1920_v48, %v2207_v20 }
 0x3ea   :  { %v341_v50 = vadd.f32 %v340_v49, %v2210_v28 }
 0x3ec   :  { %344 = vrot.lane.b32.xlu0 %v341_v50, %s2052_s27  ;;  %v342_v53 = vmul.f32 %v341_v50, %v276_v35  ;;  %v173_v35 = vadd.f32 %v2205_v17, %v2200_v13 }
 0x45e   :  { %v345_v51 = vpop.permute.xlu0 %344 }
 0x45f   :  { %v347_v52 = vmul.f32 %v345_v51, %v341_v50 }
 0x461   :  { %349 = vrot.lane.b32.xlu1 %v347_v52, %s2062_s3 }
 0x4d3   :  { %v350_v54 = vpop.permute.xlu1 %349 }
 0x4d4   :  { %v352_v55 = vadd.f32 %v350_v54, %v342_v53 }
 0x4d6   :  { %1921 = vtanh.f32 %v352_v55 }
 0x4e0   :  { %v1922_v62 = vpop.eup %1921 }
 0x4e1   :  { %355 = vrot.lane.b32.xlu0 %v1922_v62, %s2052_s27 }
 0x553   :  { %v356_v63 = vpop.permute.xlu0 %355 }
 0x554   :  { %v2240_v1 = vmul.f32 %v356_v63, %v341_v50 }
 0x556   :  { %v367_v3 = vpack.c.bf16 %v2240_v1, %v2240_v1 }
 0x558   :  { %369 = vrot.lane.b32.xlu1 %v367_v3, %s2062_s3 }
 0x5ca   :  { %v370_v8 = vpop.permute.xlu1 %369 }
 0x5cb   :  { %1766 = vmatmul.mubr.msk.bf16.vlgmr.msra.gmra.mrb[8].mxu0 %vm217_vm5, %v370_v8 }
 0x5cc   :  { %1778 = vmatpush3.bf16.msra.mxu0 %v2172_v2  ;;  %1781 = vmatprep.mubr.msk.bf16.mxu0 %vm2059_vm0, %v2058_v0 }
 0x5cd   :  { %1779 = vmatprep.subr.bf16.mxu0 %v2058_v0 }
 0x5d0   :  { %1780 = vmatpush3.bf16.msra.mxu0 %v2179_v9 }
 0x5d1   :  { %1793 = vmatprep.subr.bf16.mxu0 %v2058_v0 }
 0x69e   :  { %v408_v12 = vpop.f32.mrb[8].mxu0 }
 0x69f   :  { %v414_v15 = vadd.f32 %v408_v12, %v170_v11  ;;  %v1767_v16 = vpop.f32.mrb[9].mxu0 }
 0x6a0   :  { %v411_v18 = vpop.f32.mrb[10].mxu0 }
 0x6a1   :  { %v415_v19 = vmul.f32 %v414_v15, %v2207_v20  ;;  %v1768_v21 = vpop.f32.mrb[11].mxu0 }
 0x6a3   :  { %1923 = vtanh.f32 %v415_v19 }
 0x6ad   :  { %v1924_v22 = vpop.eup %1923 }
 0x6ae   :  { %v417_v23 = vmul.f32 %v1924_v22, %v2207_v20 }
 0x6b0   :  { %v418_v24 = vadd.f32 %v417_v23, %v2210_v28  ;;  %v181_v23 = vadd.f32 %v2200_v13, %v2251_v7 }
 0x6b2   :  { %421 = vrot.lane.b32.xlu0 %v418_v24, %s2052_s27  ;;  %v419_v14 = vmul.f32 %v418_v24, %v352_v55  ;;  %v178_v55 = vadd.f32 %v2200_v13, %v2247_v5 }
 0x724   :  { %v422_v25 = vpop.permute.xlu0 %421 }
 0x725   :  { %v424_v26 = vmul.f32 %v422_v25, %v418_v24 }
 0x727   :  { %426 = vrot.lane.b32.xlu1 %v424_v26, %s2062_s3 }
 0x799   :  { %v427_v27 = vpop.permute.xlu1 %426 }
 0x79a   :  { %v429_v29 = vadd.f32 %v427_v27, %v419_v14 }
 0x79c   :  { %1925 = vtanh.f32 %v429_v29 }
 0x7a6   :  { %v1926_v30 = vpop.eup %1925 }
 0x7a7   :  { %432 = vrot.lane.b32.xlu0 %v1926_v30, %s2052_s27 }
 0x819   :  { %v433_v31 = vpop.permute.xlu0 %432 }
 0x81a   :  { %v2268_v32 = vmul.f32 %v433_v31, %v418_v24 }
 0x81c   :  { %v444_v33 = vpack.c.bf16 %v2268_v32, %v2268_v32 }
 0x81e   :  { %446 = vrot.lane.b32.xlu1 %v444_v33, %s2062_s3 }
 0x890   :  { %v447_v34 = vpop.permute.xlu1 %446 }
 0x891   :  { %1774 = vmatmul.mubr.msk.bf16.vlgmr.msra.gmra.mrb[8].mxu1 %vm217_vm5, %v447_v34 }
 0x892   :  { %1786 = vmatpush3.bf16.msra.mxu1 %v2172_v2  ;;  %1789 = vmatprep.mubr.msk.bf16.mxu1 %vm2059_vm0, %v2058_v0 }
 0x893   :  { %1787 = vmatprep.subr.bf16.mxu1 %v2058_v0 }
 0x896   :  { %1788 = vmatpush3.bf16.msra.mxu1 %v2179_v9 }
 0x897   :  { %1801 = vmatprep.subr.bf16.mxu1 %v2058_v0 }
 0x964   :  { %v485_v36 = vpop.f32.mrb[8].mxu1 }
 0x965   :  { %v491_v37 = vadd.f32 %v485_v36, %v173_v35  ;;  %v1775_v39 = vpop.f32.mrb[9].mxu1 }
 0x966   :  { %v488_v40 = vpop.f32.mrb[10].mxu1 }
 0x967   :  { %v492_v41 = vmul.f32 %v491_v37, %v2207_v20  ;;  %v1776_v42 = vpop.f32.mrb[11].mxu1 }
 0x968   :  { %v186_v42 = vadd.f32 %v2245_v4, %v2200_v13 }
 0x969   :  { %1927 = vtanh.f32 %v492_v41 }
 0x973   :  { %v1928_v43 = vpop.eup %1927 }
 0x974   :  { %v494_v44 = vmul.f32 %v1928_v43, %v2207_v20 }
 0x976   :  { %v495_v45 = vadd.f32 %v494_v44, %v2210_v28 }
 0x978   :  { %498 = vrot.lane.b32.xlu0 %v495_v45, %s2052_s27  ;;  %v496_v17 = vmul.f32 %v495_v45, %v429_v29 }
 0x9ea   :  { %v499_v46 = vpop.permute.xlu0 %498 }
 0x9eb   :  { %v501_v47 = vmul.f32 %v499_v46, %v495_v45 }
 0x9ed   :  { %503 = vrot.lane.b32.xlu1 %v501_v47, %s2062_s3 }
 0xa5f   :  { %v504_v48 = vpop.permute.xlu1 %503 }
 0xa60   :  { %v506_v49 = vadd.f32 %v504_v48, %v496_v17 }
 0xa62   :  { %1929 = vtanh.f32 %v506_v49 }
 0xa6c   :  { %v1930_v50 = vpop.eup %1929 }
 0xa6d   :  { %509 = vrot.lane.b32.xlu0 %v1930_v50, %s2052_s27 }
 0xadf   :  { %v510_v51 = vpop.permute.xlu0 %509 }
 0xae0   :  { %v2288_v52 = vmul.f32 %v510_v51, %v495_v45 }
 0xae2   :  { %v521_v53 = vpack.c.bf16 %v2288_v52, %v2288_v52 }
 0xae4   :  { %523 = vrot.lane.b32.xlu1 %v521_v53, %s2062_s3 }
 0xb56   :  { %v524_v54 = vpop.permute.xlu1 %523 }
 0xb57   :  { %1782 = vmatmul.mubr.msk.bf16.vlgmr.msra.gmra.mrb[12].mxu0 %vm217_vm5, %v524_v54 }
 0xb58   :  { %1794 = vmatpush3.bf16.msra.mxu0 %v2172_v2  ;;  %1797 = vmatprep.mubr.msk.bf16.mxu0 %vm2059_vm0, %v2058_v0 }
 0xb59   :  { %1795 = vmatprep.subr.bf16.mxu0 %v2058_v0 }
 0xb5c   :  { %1796 = vmatpush3.bf16.msra.mxu0 %v2179_v9 }
 0xc2a   :  { %v562_v56 = vpop.f32.mrb[12].mxu0 }
 0xc2b   :  { %v568_v57 = vadd.f32 %v562_v56, %v178_v55  ;;  %v1783_v58 = vpop.f32.mrb[13].mxu0 }
 0xc2c   :  { %v565_v59 = vpop.f32.mrb[14].mxu0  ;;  %v1909_v58 = vld [vmem:[%s2569_s4] sm:$0xff]  }
 0xc2d   :  { %v569_v60 = vmul.f32 %v568_v57, %v2207_v20  ;;  %v1784_v61 = vpop.f32.mrb[15].mxu0  ;;  %1809 = vmatprep.subr.bf16.mxu0 %v1909_v58 }
 0xc2f   :  { %1931 = vtanh.f32 %v569_v60 }
 0xc39   :  { %v1932_v62 = vpop.eup %1931 }
 0xc3a   :  { %v571_v63 = vmul.f32 %v1932_v62, %v2207_v20 }
 0xc3c   :  { %v572_v3 = vadd.f32 %v571_v63, %v2210_v28 }
 0xc3e   :  { %575 = vrot.lane.b32.xlu0 %v572_v3, %s2052_s27  ;;  %v573_v5 = vmul.f32 %v572_v3, %v506_v49 }
 0xcb0   :  { %v576_v8 = vpop.permute.xlu0 %575 }
 0xcb1   :  { %v578_v11 = vmul.f32 %v576_v8, %v572_v3 }
 0xcb3   :  { %580 = vrot.lane.b32.xlu1 %v578_v11, %s2062_s3 }
 0xd25   :  { %v581_v12 = vpop.permute.xlu1 %580 }
 0xd26   :  { %v583_v15 = vadd.f32 %v581_v12, %v573_v5  ;;  %v2369_v12 = vld [vmem:[#allocation8] sm:$0xff]  }
 0xd28   :  { %1933 = vtanh.f32 %v583_v15 }
 0xd32   :  { %v1934_v16 = vpop.eup %1933 }
 0xd33   :  { %586 = vrot.lane.b32.xlu0 %v1934_v16, %s2052_s27 }
 0xda5   :  { %v587_v18 = vpop.permute.xlu0 %586 }
 0xda6   :  { %v2307_v19 = vmul.f32 %v587_v18, %v572_v3 }
 0xda8   :  { %v598_v21 = vpack.c.bf16 %v2307_v19, %v2307_v19 }
 0xdaa   :  { %600 = vrot.lane.b32.xlu1 %v598_v21, %s2062_s3 }
 0xe1c   :  { %v601_v22 = vpop.permute.xlu1 %600 }
 0xe1d   :  { %1790 = vmatmul.mubr.msk.bf16.vlgmr.msra.gmra.mrb[12].mxu1 %vm217_vm5, %v601_v22 }
 0xe1e   :  { %1802 = vmatpush3.bf16.msra.mxu1 %v2172_v2  ;;  %1805 = vmatprep.mubr.msk.bf16.mxu1 %vm2059_vm0, %v2058_v0 }
 0xe1f   :  { %1803 = vmatprep.subr.bf16.mxu1 %v2058_v0 }
 0xe22   :  { %1804 = vmatpush3.bf16.msra.mxu1 %v2179_v9 }
 0xe23   :  { %1821 = vmatprep.subr.bf16.mxu1 %v2058_v0 }
 0xef0   :  { %v639_v24 = vpop.f32.mrb[12].mxu1 }
 0xef1   :  { %v645_v25 = vadd.f32 %v639_v24, %v181_v23  ;;  %v1791_v26 = vpop.f32.mrb[13].mxu1 }
 0xef2   :  { %v642_v14 = vpop.f32.mrb[14].mxu1 }
 0xef3   :  { %v646_v27 = vmul.f32 %v645_v25, %v2207_v20  ;;  %v1792_v29 = vpop.f32.mrb[15].mxu1 }
 0xef4   :  { %v2401_v29 = vld [vmem:[%s2571_s6] ss:$0 sm:$0xff] }
 0xef5   :  { %1935 = vtanh.f32 %v646_v27 }
 0xeff   :  { %v1936_v2 = vpop.eup %1935 }
 0xf00   :  { %v648_v30 = vmul.f32 %v1936_v2, %v2207_v20 }
 0xf02   :  { %v649_v31 = vadd.f32 %v648_v30, %v2210_v28 }
 0xf04   :  { %652 = vrot.lane.b32.xlu0 %v649_v31, %s2052_s27  ;;  %v650_v7 = vmul.f32 %v649_v31, %v583_v15  ;;  %v2374_v15 = vld [vmem:[#allocation8 + $0x8] sm:$0xff]  }
 0xf76   :  { %v653_v9 = vpop.permute.xlu0 %652 }
 0xf77   :  { %v655_v33 = vmul.f32 %v653_v9, %v649_v31 }
 0xf79   :  { %657 = vrot.lane.b32.xlu1 %v655_v33, %s2062_s3 }
 0xfeb   :  { %v658_v34 = vpop.permute.xlu1 %657 }
 0xfec   :  { %v660_v35 = vadd.f32 %v658_v34, %v650_v7 }
 0xfee   :  { %1937 = vtanh.f32 %v660_v35 }
 0xff8   :  { %v1938_v36 = vpop.eup %1937 }
 0xff9   :  { %663 = vrot.lane.b32.xlu0 %v1938_v36, %s2052_s27 }
0x106b   :  { %v664_v37 = vpop.permute.xlu0 %663 }
0x106c   :  { %v2327_v39 = vmul.f32 %v664_v37, %v649_v31 }
0x106e   :  { %v675_v40 = vpack.c.bf16 %v2327_v39, %v2327_v39 }
0x1070   :  { %677 = vrot.lane.b32.xlu1 %v675_v40, %s2062_s3 }
0x10e2   :  { %v678_v41 = vpop.permute.xlu1 %677 }
0x10e3   :  { %1798 = vmatmul.mubr.msk.bf16.vlgmr.msra.gmra.mrb[16].mxu0 %vm217_vm5, %v678_v41 }
0x10e4   :  { %1810 = vmatpush3.bf16.msra.mxu0 %v1909_v58 }
0x11b6   :  { %v716_v43 = vpop.f32.mrb[16].mxu0 }
0x11b7   :  { %v722_v44 = vadd.f32 %v716_v43, %v186_v42  ;;  %v1799_v45 = vpop.f32.mrb[17].mxu0 }
0x11b8   :  { %v719_v46 = vpop.f32.mrb[18].mxu0 }
0x11b9   :  { %v723_v47 = vmul.f32 %v722_v44, %v2207_v20  ;;  %v1800_v17 = vpop.f32.mrb[19].mxu0 }
0x11bb   :  { %1939 = vtanh.f32 %v723_v47 }
0x11c5   :  { %v1940_v48 = vpop.eup %1939 }
0x11c6   :  { %v725_v49 = vmul.f32 %v1940_v48, %v2207_v20 }
0x11c8   :  { %v726_v50 = vadd.f32 %v725_v49, %v2210_v28 }
0x11ca   :  { %729 = vrot.lane.b32.xlu0 %v726_v50, %s2052_s27  ;;  %v727_v4 = vmul.f32 %v726_v50, %v660_v35 }
0x123c   :  { %v730_v51 = vpop.permute.xlu0 %729 }
0x123d   :  { %v732_v53 = vmul.f32 %v730_v51, %v726_v50 }
0x123f   :  { %734 = vrot.lane.b32.xlu1 %v732_v53, %s2062_s3 }
0x1243   :  { %284 = vrot.lane.b32.xlu1 %v2217_v38, %s2062_s3  ;;  %v1910_v38 = vld [vmem:[%s2569_s4 + $0x8] sm:$0xff]  }
0x1244   :  { %1811 = vmatprep.subr.bf16.mxu0 %v1910_v38 }
0x1245   :  { %1812 = vmatpush3.bf16.msra.mxu0 %v1910_v38 }
0x1246   :  { %1837 = vmatprep.subr.bf16.mxu0 %v2058_v0 }
0x1247   :  { %437 = vrot.lane.b32.xlu1 %v2268_v32, %s2062_s3 }
0x12b1   :  { %v735_v54 = vpop.permute.xlu1 %734 }
0x12b2   :  { %v2344_v55 = vadd.f32 %v735_v54, %v727_v4 }
0x12b4   :  { %1941 = vtanh.f32 %v2344_v55 }
0x12b5   :  { %v285_v56 = vpop.permute.xlu1 %284 }
0x12b6   :  { %287 = vst.msk [vmem:[#allocation3] sm:$0xff] %vm217_vm5, %v285_v56 }
0x12b9   :  { %v438_v57 = vpop.permute.xlu1 %437 }
0x12ba   :  { %441 = vst.msk [vmem:[#allocation3 + $0x10] sm:$0xff] %vm217_vm5, %v438_v57 }
0x12bd   :  { %v827_v3 = vld [vmem:[#allocation3] sm:$0xff] }
0x12be   :  { %v1942_v32 = vpop.eup %1941 }
0x12bf   :  { %740 = vrot.lane.b32.xlu0 %v1942_v32, %s2052_s27 }
0x12c3   :  { %360 = vrot.lane.b32.xlu0 %v2240_v1, %s2062_s3 }
0x12c7   :  { %514 = vrot.lane.b32.xlu0 %v2288_v52, %s2062_s3  ;;  %v829_v52 = vld [vmem:[#allocation3 + $0x10] sm:$0xff] }
0x1331   :  { %v741_v59 = vpop.permute.xlu0 %740 }
0x1332   :  { %v2361_v60 = vmul.f32 %v741_v59, %v726_v50 }
0x1334   :  { %v752_v61 = vpack.c.bf16 %v2361_v60, %v2361_v60 }
0x1335   :  { %v361_v62 = vpop.permute.xlu0 %360 }
0x1336   :  { %364 = vst.msk [vmem:[#allocation3 + $0x8] sm:$0xff] %vm217_vm5, %v361_v62  ;;  %754 = vrot.lane.b32.xlu1 %v752_v61, %s2062_s3 }
0x1339   :  { %v515_v63 = vpop.permute.xlu0 %514 }
0x133a   :  { %518 = vst.msk [vmem:[#allocation3 + $0x18] sm:$0xff] %vm217_vm5, %v515_v63 }
0x133d   :  { %v828_v8 = vld [vmem:[#allocation3 + $0x8] sm:$0xff] }
0x133e   :  { %v835_v1 = vpack.c.bf16 %v828_v8, %v827_v3 }
0x1340   :  { %1813 = vmatprep.mubr.msk.bf16.mxu0 %vm217_vm5, %v835_v1 }
0x1341   :  { %v830_v11 = vld [vmem:[#allocation3 + $0x18] sm:$0xff] }
0x1342   :  { %v836_v5 = vpack.c.bf16 %v830_v11, %v829_v52 }
0x1344   :  { %1814 = vmatmul.mubr.msk.bf16.vlgmr.msra.gmra.mrb[20].mxu0 %vm217_vm5, %v836_v5 }
0x1345   :  { %1838 = vmatpush3.bf16.msra.mxu0 %v2369_v12 }
0x1346   :  { %1839 = vmatprep.subr.bf16.mxu0 %v2058_v0 }
0x1349   :  { %1840 = vmatpush3.bf16.msra.mxu0 %v2374_v15 }
0x134a   :  { %1853 = vmatprep.subr.bf16.mxu0 %v2058_v0 }
0x13a8   :  { %v755_v16 = vpop.permute.xlu1 %754 }
0x13a9   :  { %1806 = vmatmul.mubr.msk.bf16.vlgmr.msra.gmra.mrb[16].mxu1 %vm217_vm5, %v755_v16 }
0x13aa   :  { %1822 = vmatpush3.bf16.msra.mxu1 %v2369_v12  ;;  %1825 = vmatprep.mubr.msk.bf16.mxu1 %vm2059_vm0, %v2058_v0 }
0x13ab   :  { %1823 = vmatprep.subr.bf16.mxu1 %v2058_v0 }
0x13ae   :  { %1824 = vmatpush3.bf16.msra.mxu1 %v2374_v15 }
0x13af   :  { %1829 = vmatprep.subr.bf16.mxu1 %v2058_v0 }
0x13b1   :  { %1826 = vmatmul.mubr.bf16.vlgmr.msra.gmra.mrb[20].mxu1 %v2060_v10  ;;  %v189_v10 = vadd.f32 %v2249_v6, %v2200_v13 }
0x13b2   :  { %1830 = vmatpush3.bf16.msra.mxu1 %v2369_v12  ;;  %1833 = vmatprep.mubr.msk.bf16.mxu1 %vm2059_vm0, %v2058_v0 }
0x13b3   :  { %1831 = vmatprep.subr.bf16.mxu1 %v2058_v0 }
0x13b6   :  { %1832 = vmatpush3.bf16.msra.mxu1 %v2374_v15 }
0x13b7   :  { %1845 = vmatprep.subr.bf16.mxu1 %v2058_v0 }
0x1417   :  { %v2392_v18 = vpop.f32.mrb[20].mxu0 }
0x1418   :  { %v908_v21 = vpop.f32.mrb[21].mxu0 }
0x1419   :  { %v2394_v22 = vpop.f32.mrb[22].mxu0  ;;  %v909_v2 = vadd.f32 %v2401_v29, %v908_v21 }
0x141a   :  { %v911_v23 = vpop.f32.mrb[23].mxu0 }
0x141b   :  { %v912_v32 = vadd.f32 %v2401_v29, %v911_v23 }
0x147c   :  { %v793_v24 = vpop.f32.mrb[16].mxu1 }
0x147d   :  { %v799_v25 = vadd.f32 %v793_v24, %v189_v10  ;;  %v1807_v26 = vpop.f32.mrb[17].mxu1 }
0x147e   :  { %v796_v14 = vpop.f32.mrb[18].mxu1 }
0x147f   :  { %v1808_v27 = vpop.f32.mrb[19].mxu1  ;;  %v800_v40 = vmul.f32 %v799_v25, %v2207_v20 }
0x1484   :  { %v998_v30 = vpop.f32.mrb[20].mxu1 }
0x1485   :  { %v1004_v31 = vadd.f32 %v998_v30, %v909_v2  ;;  %v1827_v9 = vpop.f32.mrb[21].mxu1 }
0x1486   :  { %v1001_v33 = vpop.f32.mrb[22].mxu1 }
0x1487   :  { %v1005_v7 = vmul.f32 %v1004_v31, %v2207_v20  ;;  %v1828_v34 = vpop.f32.mrb[23].mxu1 }
0x1489   :  { %1943 = vtanh.f32 %v1005_v7 }
0x148a   :  { %1945 = vtanh.f32 %v800_v40 }
0x1493   :  { %v1944_v13 = vpop.eup %1943 }
0x1494   :  { %v1007_v6 = vmul.f32 %v1944_v13, %v2207_v20  ;;  %v1946_v44 = vpop.eup %1945 }
0x1495   :  { %v802_v45 = vmul.f32 %v1946_v44, %v2207_v20 }
0x1496   :  { %v1008_v35 = vadd.f32 %v1007_v6, %v2210_v28 }
0x1497   :  { %v803_v47 = vadd.f32 %v802_v45, %v2210_v28 }
0x1498   :  { %1011 = vrot.lane.b32.xlu0 %v1008_v35, %s2052_s27  ;;  %v1009_v41 = vmul.f32 0.0, %v1008_v35 }
0x1499   :  { %v804_v4 = vmul.f32 %v803_v47, %v2344_v55 }
0x150a   :  { %v1012_v36 = vpop.permute.xlu0 %1011 }
0x150b   :  { %v1014_v37 = vmul.f32 %v1012_v36, %v1008_v35  ;;  %v917_v36 = vadd.f32 %v2392_v18, %v2401_v29 }
0x150d   :  { %1016 = vrot.lane.b32.xlu1 %v1014_v37, %s2062_s3 }
0x157f   :  { %v1017_v42 = vpop.permute.xlu1 %1016 }
0x1580   :  { %v1019_v43 = vadd.f32 %v1017_v42, %v1009_v41 }
0x1582   :  { %1947 = vtanh.f32 %v1019_v43 }
0x158c   :  { %v1948_v46 = vpop.eup %1947 }
0x158d   :  { %1022 = vrot.lane.b32.xlu0 %v1948_v46, %s2052_s27 }
0x1591   :  { %806 = vrot.lane.b32.xlu0 %v803_v47, %s2052_s27 }
0x15ff   :  { %v1023_v17 = vpop.permute.xlu0 %1022 }
0x1600   :  { %v1025_v48 = vmul.f32 %v1023_v17, %v1008_v35 }
0x1602   :  { %v1027_v49 = vpack.c.bf16 %v1025_v48, %v1025_v48 }
0x1603   :  { %v807_v50 = vpop.permute.xlu0 %806 }
0x1604   :  { %v809_v51 = vmul.f32 %v807_v50, %v803_v47  ;;  %1029 = vrot.lane.b32.xlu1 %v1027_v49, %s2062_s3 }
0x1606   :  { %811 = vrot.lane.b32.xlu0 %v809_v51, %s2062_s3 }
0x1676   :  { %v1030_v53 = vpop.permute.xlu1 %1029 }
0x1677   :  { %1834 = vmatmul.mubr.msk.bf16.vlgmr.msra.gmra.mrb[24].mxu1 %vm217_vm5, %v1030_v53 }
0x1678   :  { %v812_v54 = vpop.permute.xlu0 %811  ;;  %1846 = vmatpush3.bf16.msra.mxu1 %v2369_v12  ;;  %1849 = vmatprep.mubr.msk.bf16.mxu1 %vm2059_vm0, %v2058_v0 }
0x1679   :  { %v814_v56 = vadd.f32 %v812_v54, %v804_v4  ;;  %1847 = vmatprep.subr.bf16.mxu1 %v2058_v0 }
0x167b   :  { %1949 = vtanh.f32 %v814_v56 }
0x167c   :  { %1848 = vmatpush3.bf16.msra.mxu1 %v2374_v15 }
0x167d   :  { %1861 = vmatprep.subr.bf16.mxu1 %v2058_v0 }
0x1685   :  { %v1950_v57 = vpop.eup %1949 }
0x1686   :  { %817 = vrot.lane.b32.xlu0 %v1950_v57, %s2052_s27  ;;  %v920_v57 = vadd.f32 %v2394_v22, %v2401_v29 }
0x168a   :  { %591 = vrot.lane.b32.xlu0 %v2307_v19, %s2062_s3 }
0x168e   :  { %745 = vrot.lane.b32.xlu0 %v2361_v60, %s2062_s3 }
0x16f8   :  { %v818_v55 = vpop.permute.xlu0 %817 }
0x16f9   :  { %v820_v10 = vmul.f32 %v818_v55, %v803_v47 }
0x16fc   :  { %v592_v58 = vpop.permute.xlu0 %591 }
0x16fd   :  { %595 = vst.msk [vmem:[#allocation3 + $0x20] sm:$0xff] %vm217_vm5, %v592_v58 }
0x1700   :  { %v746_v38 = vpop.permute.xlu0 %745 }
0x1701   :  { %749 = vst.msk [vmem:[#allocation3 + $0x30] sm:$0xff] %vm217_vm5, %v746_v38 }
0x1704   :  { %v831_v2 = vld [vmem:[#allocation3 + $0x20] sm:$0xff] }
0x174a   :  { %v1068_v59 = vpop.f32.mrb[24].mxu1 }
0x174b   :  { %v1074_v61 = vadd.f32 %v1068_v59, %v912_v32  ;;  %v1835_v62 = vpop.f32.mrb[25].mxu1 }
0x174c   :  { %v1071_v63 = vpop.f32.mrb[26].mxu1 }
0x174d   :  { %v1075_v3 = vmul.f32 %v1074_v61, %v2207_v20  ;;  %v1836_v8 = vpop.f32.mrb[27].mxu1 }
0x174f   :  { %1951 = vtanh.f32 %v1075_v3 }
0x1759   :  { %v1952_v19 = vpop.eup %1951 }
0x175a   :  { %v1077_v60 = vmul.f32 %v1952_v19, %v2207_v20 }
0x175c   :  { %v1078_v1 = vadd.f32 %v1077_v60, %v2210_v28 }
0x175e   :  { %1081 = vrot.lane.b32.xlu1 %v1078_v1, %s2052_s27  ;;  %v1079_v5 = vmul.f32 %v1078_v1, %v1019_v43 }
0x17d0   :  { %v1082_v52 = vpop.permute.xlu1 %1081 }
0x17d1   :  { %v1084_v11 = vmul.f32 %v1082_v52, %v1078_v1 }
0x17d3   :  { %1086 = vrot.lane.b32.xlu1 %v1084_v11, %s2062_s3 }
0x1845   :  { %v1087_v16 = vpop.permute.xlu1 %1086 }
0x1846   :  { %v1089_v21 = vadd.f32 %v1087_v16, %v1079_v5 }
0x1848   :  { %1953 = vtanh.f32 %v1089_v21 }
0x1852   :  { %v1954_v23 = vpop.eup %1953 }
0x1853   :  { %1092 = vrot.lane.b32.xlu1 %v1954_v23, %s2052_s27 }
0x1857   :  { %668 = vrot.lane.b32.xlu1 %v2327_v39, %s2062_s3  ;;  %v833_v39 = vld [vmem:[#allocation3 + $0x30] sm:$0xff] }
0x185b   :  { %822 = vrot.lane.b32.xlu1 %v820_v10, %s2062_s3 }
0x18c5   :  { %v1093_v24 = vpop.permute.xlu1 %1092 }
0x18c6   :  { %v1095_v25 = vmul.f32 %v1093_v24, %v1078_v1 }
0x18c8   :  { %v1097_v26 = vpack.c.bf16 %v1095_v25, %v1095_v25 }
0x18c9   :  { %v669_v14 = vpop.permute.xlu1 %668 }
0x18ca   :  { %672 = vst.msk [vmem:[#allocation3 + $0x28] sm:$0xff] %vm217_vm5, %v669_v14  ;;  %1099 = vrot.lane.b32.xlu0 %v1097_v26, %s2062_s3 }
0x18cd   :  { %v823_v27 = vpop.permute.xlu1 %822 }
0x18ce   :  { %826 = vst.msk [vmem:[#allocation3 + $0x38] sm:$0xff] %vm217_vm5, %v823_v27 }
0x18d1   :  { %v832_v30 = vld [vmem:[#allocation3 + $0x28] sm:$0xff] }
0x18d2   :  { %v837_v31 = vpack.c.bf16 %v832_v30, %v831_v2 }
0x18d4   :  { %1817 = vmatprep.mubr.msk.bf16.mxu0 %vm217_vm5, %v837_v31 }
0x18d5   :  { %v834_v9 = vld [vmem:[#allocation3 + $0x38] sm:$0xff] }
0x18d6   :  { %v838_v33 = vpack.c.bf16 %v834_v9, %v833_v39 }
0x18d8   :  { %1818 = vmatmul.mubr.msk.bf16.gmra.mrb[24].mxu0 %vm217_vm5, %v838_v33 }
0x18d9   :  { %1841 = vmatprep.mubr.msk.bf16.mxu0 %vm2059_vm0, %v2058_v0 }
0x193c   :  { %v1100_v7 = vpop.permute.xlu0 %1099 }
0x193d   :  { %1842 = vmatmul.mubr.msk.bf16.vlgmr.msra.gmra.mrb[28].mxu0 %vm217_vm5, %v1100_v7 }
0x193e   :  { %1854 = vmatpush3.bf16.msra.mxu0 %v2369_v12  ;;  %1857 = vmatprep.mubr.msk.bf16.mxu0 %vm2059_vm0, %v2058_v0 }
0x193f   :  { %1855 = vmatprep.subr.bf16.mxu0 %v2058_v0 }
0x1942   :  { %1856 = vmatpush3.bf16.msra.mxu0 %v2374_v15 }
0x1943   :  { %1869 = vmatprep.subr.bf16.mxu0 %v2058_v0 }
0x19ab   :  { %v2455_v34 = vpop.f32.mrb[24].mxu0 }
0x19ac   :  { %v2457_v13 = vpop.f32.mrb[25].mxu0 }
0x19ad   :  { %v2459_v6 = vpop.f32.mrb[26].mxu0  ;;  %v925_v23 = vadd.f32 %v2401_v29, %v2457_v13 }
0x19ae   :  { %v2461_v35 = vpop.f32.mrb[27].mxu0 }
0x1a10   :  { %v1138_v37 = vpop.f32.mrb[28].mxu0 }
0x1a11   :  { %v1144_v40 = vadd.f32 %v1138_v37, %v917_v36  ;;  %v1843_v41 = vpop.f32.mrb[29].mxu0 }
0x1a12   :  { %v1141_v42 = vpop.f32.mrb[30].mxu0 }
0x1a13   :  { %v1145_v43 = vmul.f32 %v1144_v40, %v2207_v20  ;;  %v1844_v44 = vpop.f32.mrb[31].mxu0 }
0x1a15   :  { %1955 = vtanh.f32 %v1145_v43  ;;  %v928_v43 = vadd.f32 %v2401_v29, %v2461_v35 }
0x1a1f   :  { %v1956_v45 = vpop.eup %1955 }
0x1a20   :  { %v1147_v46 = vmul.f32 %v1956_v45, %v2207_v20 }
0x1a22   :  { %v1148_v47 = vadd.f32 %v1147_v46, %v2210_v28 }
0x1a24   :  { %1151 = vrot.lane.b32.xlu1 %v1148_v47, %s2052_s27  ;;  %v1149_v18 = vmul.f32 %v1148_v47, %v1089_v21 }
0x1a96   :  { %v1152_v17 = vpop.permute.xlu1 %1151 }
0x1a97   :  { %v1154_v48 = vmul.f32 %v1152_v17, %v1148_v47 }
0x1a99   :  { %1156 = vrot.lane.b32.xlu0 %v1154_v48, %s2062_s3 }
0x1b0b   :  { %v1157_v49 = vpop.permute.xlu0 %1156 }
0x1b0c   :  { %v1159_v50 = vadd.f32 %v1157_v49, %v1149_v18 }
0x1b0e   :  { %1957 = vtanh.f32 %v1159_v50 }
0x1b18   :  { %v1958_v51 = vpop.eup %1957 }
0x1b19   :  { %1162 = vrot.lane.b32.xlu1 %v1958_v51, %s2052_s27 }
0x1b8b   :  { %v1163_v53 = vpop.permute.xlu1 %1162 }
0x1b8c   :  { %v1165_v4 = vmul.f32 %v1163_v53, %v1148_v47 }
0x1b8e   :  { %v1167_v54 = vpack.c.bf16 %v1165_v4, %v1165_v4 }
0x1b90   :  { %1169 = vrot.lane.b32.xlu0 %v1167_v54, %s2062_s3 }
0x1c02   :  { %v1170_v56 = vpop.permute.xlu0 %1169 }
0x1c03   :  { %1850 = vmatmul.mubr.msk.bf16.vlgmr.msra.gmra.mrb[28].mxu1 %vm217_vm5, %v1170_v56 }
0x1c04   :  { %1862 = vmatpush3.bf16.msra.mxu1 %v2369_v12  ;;  %1865 = vmatprep.mubr.msk.bf16.mxu1 %vm2059_vm0, %v2058_v0 }
0x1c05   :  { %1863 = vmatprep.subr.bf16.mxu1 %v2058_v0 }
0x1c08   :  { %1864 = vmatpush3.bf16.msra.mxu1 %v2374_v15 }
0x1c09   :  { %1877 = vmatprep.subr.bf16.mxu1 %v2058_v0 }
0x1cd6   :  { %v1208_v55 = vpop.f32.mrb[28].mxu1 }
0x1cd7   :  { %v1214_v58 = vadd.f32 %v1208_v55, %v920_v57  ;;  %v1851_v38 = vpop.f32.mrb[29].mxu1 }
0x1cd8   :  { %v1211_v32 = vpop.f32.mrb[30].mxu1 }
0x1cd9   :  { %v1215_v59 = vmul.f32 %v1214_v58, %v2207_v20  ;;  %v1852_v61 = vpop.f32.mrb[31].mxu1  ;;  %v933_v58 = vadd.f32 %v2455_v34, %v2401_v29 }
0x1cdb   :  { %1959 = vtanh.f32 %v1215_v59 }
0x1ce5   :  { %v1960_v62 = vpop.eup %1959 }
0x1ce6   :  { %v1217_v63 = vmul.f32 %v1960_v62, %v2207_v20 }
0x1ce8   :  { %v1218_v3 = vadd.f32 %v1217_v63, %v2210_v28 }
0x1cea   :  { %1221 = vrot.lane.b32.xlu1 %v1218_v3, %s2052_s27  ;;  %v1219_v22 = vmul.f32 %v1218_v3, %v1159_v50 }
0x1d5c   :  { %v1222_v8 = vpop.permute.xlu1 %1221 }
0x1d5d   :  { %v1224_v19 = vmul.f32 %v1222_v8, %v1218_v3 }
0x1d5f   :  { %1226 = vrot.lane.b32.xlu0 %v1224_v19, %s2062_s3 }
0x1dd1   :  { %v1227_v60 = vpop.permute.xlu0 %1226 }
0x1dd2   :  { %v1229_v1 = vadd.f32 %v1227_v60, %v1219_v22 }
0x1dd4   :  { %1961 = vtanh.f32 %v1229_v1 }
0x1dde   :  { %v1962_v52 = vpop.eup %1961 }
0x1ddf   :  { %1232 = vrot.lane.b32.xlu1 %v1962_v52, %s2052_s27 }
0x1e51   :  { %v1233_v11 = vpop.permute.xlu1 %1232 }
0x1e52   :  { %v1235_v5 = vmul.f32 %v1233_v11, %v1218_v3 }
0x1e54   :  { %v1237_v16 = vpack.c.bf16 %v1235_v5, %v1235_v5 }
0x1e56   :  { %1239 = vrot.lane.b32.xlu0 %v1237_v16, %s2062_s3 }
0x1ec8   :  { %v1240_v21 = vpop.permute.xlu0 %1239 }
0x1ec9   :  { %1858 = vmatmul.mubr.msk.bf16.vlgmr.msra.gmra.mrb[32].mxu0 %vm217_vm5, %v1240_v21 }
0x1eca   :  { %1870 = vmatpush3.bf16.msra.mxu0 %v2369_v12  ;;  %1873 = vmatprep.mubr.msk.bf16.mxu0 %vm2059_vm0, %v2058_v0 }
0x1ecb   :  { %1871 = vmatprep.subr.bf16.mxu0 %v2058_v0 }
0x1ece   :  { %1872 = vmatpush3.bf16.msra.mxu0 %v2374_v15 }
0x1ecf   :  { %1885 = vmatprep.subr.bf16.mxu0 %v2058_v0 }
0x1f9c   :  { %v1278_v10 = vpop.f32.mrb[32].mxu0 }
0x1f9d   :  { %v1284_v24 = vadd.f32 %v1278_v10, %v925_v23  ;;  %v1859_v25 = vpop.f32.mrb[33].mxu0  ;;  %v936_v10 = vadd.f32 %v2459_v6, %v2401_v29 }
0x1f9e   :  { %v1281_v26 = vpop.f32.mrb[34].mxu0 }
0x1f9f   :  { %v1285_v14 = vmul.f32 %v1284_v24, %v2207_v20  ;;  %v1860_v27 = vpop.f32.mrb[35].mxu0 }
0x1fa1   :  { %1963 = vtanh.f32 %v1285_v14 }
0x1fab   :  { %v1964_v2 = vpop.eup %1963 }
0x1fac   :  { %v1287_v30 = vmul.f32 %v1964_v2, %v2207_v20 }
0x1fae   :  { %v1288_v31 = vadd.f32 %v1287_v30, %v2210_v28 }
0x1fb0   :  { %1291 = vrot.lane.b32.xlu1 %v1288_v31, %s2052_s27  ;;  %v1289_v33 = vmul.f32 %v1288_v31, %v1229_v1 }
0x2022   :  { %v1292_v39 = vpop.permute.xlu1 %1291 }
0x2023   :  { %v1294_v9 = vmul.f32 %v1292_v39, %v1288_v31 }
0x2025   :  { %1296 = vrot.lane.b32.xlu0 %v1294_v9, %s2062_s3 }
0x2097   :  { %v1297_v7 = vpop.permute.xlu0 %1296 }
0x2098   :  { %v1299_v13 = vadd.f32 %v1297_v7, %v1289_v33 }
0x209a   :  { %1965 = vtanh.f32 %v1299_v13 }
0x20a4   :  { %v1966_v36 = vpop.eup %1965 }
0x20a5   :  { %1302 = vrot.lane.b32.xlu1 %v1966_v36, %s2052_s27 }
0x2117   :  { %v1303_v37 = vpop.permute.xlu1 %1302 }
0x2118   :  { %v1305_v40 = vmul.f32 %v1303_v37, %v1288_v31 }
0x211a   :  { %v1307_v41 = vpack.c.bf16 %v1305_v40, %v1305_v40  ;;  %v1667_v40 = vld [vmem:[%s2572_s7] ss:$0 sm:$0xff] }
0x211c   :  { %1309 = vrot.lane.b32.xlu0 %v1307_v41, %s2062_s3 }
0x218e   :  { %v1310_v42 = vpop.permute.xlu0 %1309 }
0x218f   :  { %1866 = vmatmul.mubr.msk.bf16.vlgmr.msra.gmra.mrb[32].mxu1 %vm217_vm5, %v1310_v42 }
0x2190   :  { %1878 = vmatpush3.bf16.msra.mxu1 %v2369_v12  ;;  %1881 = vmatprep.mubr.msk.bf16.mxu1 %vm2059_vm0, %v2058_v0 }
0x2191   :  { %1879 = vmatprep.subr.bf16.mxu1 %v2058_v0 }
0x2194   :  { %1880 = vmatpush3.bf16.msra.mxu1 %v2374_v15 }
0x2262   :  { %v1348_v44 = vpop.f32.mrb[32].mxu1 }
0x2263   :  { %v1354_v45 = vadd.f32 %v1348_v44, %v928_v43  ;;  %v1867_v46 = vpop.f32.mrb[33].mxu1 }
0x2264   :  { %v1351_v47 = vpop.f32.mrb[34].mxu1 }
0x2265   :  { %v1355_v17 = vmul.f32 %v1354_v45, %v2207_v20  ;;  %v1868_v48 = vpop.f32.mrb[35].mxu1  ;;  %v1668_v47 = vld [vmem:[%s2573_s8] ss:$0 sm:$0xff] }
0x2266   :  { %v1914_v48 = vld [vmem:[%s2574_s9 + $0x8] sm:$0xff]  }
0x2267   :  { %1967 = vtanh.f32 %v1355_v17  ;;  %v1913_v17 = vld [vmem:[%s2574_s9] sm:$0xff]  }
0x2271   :  { %v1968_v18 = vpop.eup %1967 }
0x2272   :  { %v1357_v12 = vmul.f32 %v1968_v18, %v2207_v20 }
0x2274   :  { %v1358_v49 = vadd.f32 %v1357_v12, %v2210_v28 }
0x2276   :  { %1361 = vrot.lane.b32.xlu1 %v1358_v49, %s2052_s27  ;;  %v1359_v35 = vmul.f32 %v1358_v49, %v1299_v13 }
0x22e8   :  { %v1362_v50 = vpop.permute.xlu1 %1361 }
0x22e9   :  { %v1364_v15 = vmul.f32 %v1362_v50, %v1358_v49 }
0x22eb   :  { %1366 = vrot.lane.b32.xlu0 %v1364_v15, %s2062_s3 }
0x235d   :  { %v1367_v51 = vpop.permute.xlu0 %1366 }
0x235e   :  { %v1369_v53 = vadd.f32 %v1367_v51, %v1359_v35 }
0x2360   :  { %1969 = vtanh.f32 %v1369_v53 }
0x236a   :  { %v1970_v4 = vpop.eup %1969 }
0x236b   :  { %1372 = vrot.lane.b32.xlu1 %v1970_v4, %s2052_s27 }
0x23dd   :  { %v1373_v54 = vpop.permute.xlu1 %1372 }
0x23de   :  { %v1375_v56 = vmul.f32 %v1373_v54, %v1358_v49 }
0x23e0   :  { %v1377_v57 = vpack.c.bf16 %v1375_v56, %v1375_v56 }
0x23e2   :  { %1379 = vrot.lane.b32.xlu0 %v1377_v57, %s2062_s3 }
0x2454   :  { %v1380_v55 = vpop.permute.xlu0 %1379 }
0x2455   :  { %1874 = vmatmul.mubr.msk.bf16.vlgmr.msra.gmra.mrb[36].mxu0 %vm217_vm5, %v1380_v55 }
0x2456   :  { %1889 = vmatprep.mubr.msk.bf16.mxu0 %vm2059_vm0, %v2058_v0  ;;  %1886 = vmatpush3.bf16.msra.mxu0 %v1913_v17 }
0x2457   :  { %1887 = vmatprep.subr.bf16.mxu0 %v2058_v0  ;;  %v1669_v0 = vld [vmem:[%s2575_s10] ss:$0 sm:$0xff] }
0x245a   :  { %1888 = vmatpush3.bf16.msra.mxu0 %v1914_v48 }
0x2528   :  { %v1418_v38 = vpop.f32.mrb[36].mxu0 }
0x2529   :  { %v1424_v32 = vadd.f32 %v1418_v38, %v933_v58  ;;  %v1875_v59 = vpop.f32.mrb[37].mxu0 }
0x252a   :  { %v1421_v61 = vpop.f32.mrb[38].mxu0 }
0x252b   :  { %v1425_v62 = vmul.f32 %v1424_v32, %v2207_v20  ;;  %v1876_v63 = vpop.f32.mrb[39].mxu0 }
0x252d   :  { %1971 = vtanh.f32 %v1425_v62 }
0x2537   :  { %v1972_v3 = vpop.eup %1971 }
0x2538   :  { %v1427_v8 = vmul.f32 %v1972_v3, %v2207_v20 }
0x253a   :  { %v1428_v19 = vadd.f32 %v1427_v8, %v2210_v28 }
0x253c   :  { %1431 = vrot.lane.b32.xlu1 %v1428_v19, %s2052_s27  ;;  %v1429_v34 = vmul.f32 %v1428_v19, %v1369_v53 }
0x25ae   :  { %v1432_v22 = vpop.permute.xlu1 %1431 }
0x25af   :  { %v1434_v60 = vmul.f32 %v1432_v22, %v1428_v19 }
0x25b1   :  { %1436 = vrot.lane.b32.xlu0 %v1434_v60, %s2062_s3 }
0x2623   :  { %v1437_v1 = vpop.permute.xlu0 %1436 }
0x2624   :  { %v1439_v52 = vadd.f32 %v1437_v1, %v1429_v34 }
0x2626   :  { %1973 = vtanh.f32 %v1439_v52 }
0x2630   :  { %v1974_v11 = vpop.eup %1973 }
0x2631   :  { %1442 = vrot.lane.b32.xlu1 %v1974_v11, %s2052_s27 }
0x26a3   :  { %v1443_v5 = vpop.permute.xlu1 %1442 }
0x26a4   :  { %v1445_v16 = vmul.f32 %v1443_v5, %v1428_v19 }
0x26a6   :  { %v1447_v21 = vpack.c.bf16 %v1445_v16, %v1445_v16 }
0x26a8   :  { %1449 = vrot.lane.b32.xlu0 %v1447_v21, %s2062_s3 }
0x271a   :  { %v1450_v23 = vpop.permute.xlu0 %1449 }
0x271b   :  { %1882 = vmatmul.mubr.msk.bf16.vlgmr.msra.gmra.mrb[36].mxu1 %vm217_vm5, %v1450_v23 }
0x27ee   :  { %v1488_v24 = vpop.f32.mrb[36].mxu1 }
0x27ef   :  { %v1494_v25 = vadd.f32 %v1488_v24, %v936_v10  ;;  %v1883_v26 = vpop.f32.mrb[37].mxu1 }
0x27f0   :  { %v1491_v14 = vpop.f32.mrb[38].mxu1 }
0x27f1   :  { %v1495_v27 = vmul.f32 %v1494_v25, %v2207_v20  ;;  %v1884_v2 = vpop.f32.mrb[39].mxu1 }
0x27f3   :  { %1975 = vtanh.f32 %v1495_v27 }
0x27fd   :  { %v1976_v30 = vpop.eup %1975 }
0x27fe   :  { %v1497_v31 = vmul.f32 %v1976_v30, %v2207_v20 }
0x2800   :  { %v1498_v39 = vadd.f32 %v1497_v31, %v2210_v28 }
0x2802   :  { %1501 = vrot.lane.b32.xlu1 %v1498_v39, %s2052_s27  ;;  %v1499_v29 = vmul.f32 %v1498_v39, %v1439_v52 }
0x2874   :  { %v1502_v9 = vpop.permute.xlu1 %1501 }
0x2875   :  { %v1504_v33 = vmul.f32 %v1502_v9, %v1498_v39 }
0x2877   :  { %1506 = vrot.lane.b32.xlu0 %v1504_v33, %s2062_s3 }
0x28e9   :  { %v1507_v6 = vpop.permute.xlu0 %1506 }
0x28ea   :  { %v1509_v7 = vadd.f32 %v1507_v6, %v1499_v29 }
0x28ec   :  { %1977 = vtanh.f32 %v1509_v7 }
0x28f6   :  { %v1978_v13 = vpop.eup %1977 }
0x28f7   :  { %1512 = vrot.lane.b32.xlu1 %v1978_v13, %s2052_s27 }
0x2969   :  { %v1513_v36 = vpop.permute.xlu1 %1512 }
0x296a   :  { %v1515_v37 = vmul.f32 %v1513_v36, %v1498_v39 }
0x296c   :  { %1517 = vrot.lane.b32.xlu0 %v1515_v37, %s2062_s3 }
0x29de   :  { %v1518_v20 = vpop.permute.xlu0 %1517 }
0x29df   :  { %v1520_v28 = vsel %vm217_vm5, %v1518_v20, 0.0 }
0x29e0   :  { %1521 = vadd.xlane.f32.xlu1 %v1520_v28 }
0x29f1   :  { %1544 = vrot.lane.b32.xlu1 %v1667_v40, %s2063_s29 }
0x2a6d   :  { %v1522_v41 = vpop.xlane.xlu1 %1521 }
0x2a6e   :  { %v1524_v42 = vmul.f32 0.03125, %v1522_v41 }
0x2a70   :  { %v1525_v43 = vsub.f32 %v1515_v37, %v1524_v42 }
0x2a71   :  { %v1545_v15 = vpop.permute.xlu1 %1544 }
0x2a72   :  { %v1526_v44 = vmul.f32 %v1525_v43, %v1525_v43 }
0x2a74   :  { %1528 = vrot.lane.b32.xlu0 %v1526_v44, %s2062_s3 }
0x2ae6   :  { %v1529_v45 = vpop.permute.xlu0 %1528 }
0x2ae7   :  { %v1531_v46 = vsel %vm217_vm5, %v1529_v45, 0.0 }
0x2ae8   :  { %1532 = vadd.xlane.f32.xlu0 %v1531_v46 }
0x2afe   :  { %1554 = vrot.lane.b32.xlu0 %v1668_v47, %s2063_s29 }
0x2b75   :  { %v1533_v18 = vpop.xlane.xlu0 %1532 }
0x2b76   :  { %v1534_v12 = vmul.f32 0.03125, %v1533_v18 }
0x2b78   :  { %v1535_v49 = vadd.f32 1e-05, %v1534_v12 }
0x2b79   :  { %v1555_v51 = vpop.permute.xlu0 %1554 }
0x2b7a   :  { %1979 = vrsqrt.f32 %v1535_v49 }
0x2b84   :  { %v1980_v50 = vpop.eup %1979 }
0x2b85   :  { %v1537_v35 = vmul.f32 %v1980_v50, %v1525_v43 }
0x2b87   :  { %v1547_v53 = vmul.f32 %v1545_v15, %v1537_v35 }
0x2b89   :  { %v1557_v4 = vadd.f32 %v1555_v51, %v1547_v53 }
0x2b8b   :  { %v1558_v54 = vpack.c.bf16 %v1557_v4, %v1557_v4 }
0x2b8d   :  { %1571 = vrot.lane.b32.xlu1 %v1558_v54, %s2062_s3 }
0x2bff   :  { %v1572_v56 = vpop.permute.xlu1 %1571 }
0x2c00   :  { %1890 = vmatmul.mubr.msk.bf16.vlgmr.msra.gmra.mrb[40].mxu0 %vm217_vm5, %v1572_v56 }
0x2cd3   :  { %v1622_v57 = vpop.f32.mrb[40].mxu0 }
0x2cd4   :  { %v1623_v55 = vadd.f32 %v1669_v0, %v1622_v57  ;;  %v1891_v58 = vpop.f32.mrb[41].mxu0 }
0x2cd5   :  { %v1625_v38 = vpop.f32.mrb[42].mxu0 }
0x2cd6   :  { %1629 = vst.msk [vmem:[%s2576_s11] sm:$0xff] %vm1628_vm6, %v1623_v55  ;;  %v1892_v32 = vpop.f32.mrb[43].mxu0 }
0x2cd7   :  { %1634 = vsyncpa [#allocation5], 1 }
0x2cd8   :  { %1635 = vsyncpa [#allocation7], 1 }

</bundles_post_ra>
